<compile_context>
chip_gen: v7x
topology: tpu7x:2x2x1
jax: 0.10.0
libtpu: 0.0.40
codegen_flags: <defaults>
</compile_context>

<pallas_src>
import jax
import jax.numpy as jnp
from jax.experimental import pallas as pl
from jax.experimental.pallas import tpu as pltpu

_INV_SQRT2 = 0.7071067811865476
_LANE = 128


# ---------------------------------------------------------------------------
# Parameter packing (host-side, one-time): 15 tiny tensors -> 2 VMEM slabs.
# ---------------------------------------------------------------------------
def _plan(entries, row_align):
    """entries: [(name, (rows, cols))] -> ({name: (row_off, rows, cols)}, total_rows)."""
    offs, r = {}, 0
    for name, (nr, nc) in entries:
        r = -(-r // row_align) * row_align
        offs[name] = (r, nr, nc)
        r += nr
    total = -(-r // row_align) * row_align
    return offs, max(total, row_align)


def pack_params(params):
    num_layers = len(params["gru"])
    num_linears = len(params["linears"])
    hidden = params["gru"][0]["whh"].shape[0]

    w_entries = [("emb_w", params["emb_w"].shape)]
    b_entries = [("emb_b", params["emb_b"].shape)]
    for l, lp in enumerate(params["gru"]):
        w_entries += [(f"wih{l}", lp["wih"].shape), (f"whh{l}", lp["whh"].shape)]
        b_entries += [(f"bih{l}", lp["bih"].shape), (f"bhh{l}", lp["bhh"].shape)]
    for i, (w, b) in enumerate(params["linears"]):
        w_entries += [(f"lin{i}_w", w.shape)]
        b_entries += [(f"lin{i}_b", b.shape)]

    # bf16 sublane packing is 16 rows -> align every matrix to a 16-row start.
    w_off, w_rows = _plan(w_entries, 16)
    b_off, b_rows = _plan(b_entries, 1)
    b_rows = -(-b_rows // 8) * 8

    w_buf = jnp.zeros((w_rows, _LANE), jnp.bfloat16)   # MXU operands -> bf16
    b_buf = jnp.zeros((b_rows, _LANE), jnp.float32)    # biases stay f32

    def put(buf, off_map, name, arr, dtype):
        r, nr, nc = off_map[name]
        return buf.at[r:r + nr, :nc].set(arr.astype(dtype))

    w_buf = put(w_buf, w_off, "emb_w", params["emb_w"], jnp.bfloat16)
    b_buf = put(b_buf, b_off, "emb_b", params["emb_b"], jnp.float32)
    for l, lp in enumerate(params["gru"]):
        w_buf = put(w_buf, w_off, f"wih{l}", lp["wih"], jnp.bfloat16)
        w_buf = put(w_buf, w_off, f"whh{l}", lp["whh"], jnp.bfloat16)
        b_buf = put(b_buf, b_off, f"bih{l}", lp["bih"], jnp.float32)
        b_buf = put(b_buf, b_off, f"bhh{l}", lp["bhh"], jnp.float32)
    for i, (w, b) in enumerate(params["linears"]):
        w_buf = put(w_buf, w_off, f"lin{i}_w", w, jnp.bfloat16)
        b_buf = put(b_buf, b_off, f"lin{i}_b", b, jnp.float32)

    meta = {"H": hidden, "num_layers": num_layers, "num_linears": num_linears}
    return w_buf, b_buf, w_off, b_off, meta


# ---------------------------------------------------------------------------
# Fused kernel
# ---------------------------------------------------------------------------
def _make_fused_kernel(B, T, H, num_layers, num_linears, w_off, b_off):
    G = 3 * H

    def kernel(x_ref, w_ref, b_ref, o_ref):
        f32, bf16 = jnp.float32, jnp.bfloat16

        def W(name):                         # bf16 weight matrix (static slice)
            r, nr, nc = w_off[name]
            return w_ref[r:r + nr, :nc]

        def Bv(name):                        # f32 bias row (1, nc)
            r, nr, nc = b_off[name]
            return b_ref[r:r + nr, :nc]

        def mm(a_f32, w_bf16):               # bf16 MXU operands, f32 accumulate
            return jnp.dot(a_f32.astype(bf16), w_bf16,
                           preferred_element_type=f32)

        # ---- build the time-major (T*B, D_in) input once, in-kernel --------
        # (no wrapper-side transpose/dispatch; this is off the serial chain)
        x_tm = jnp.concatenate([x_ref[:, t, :] for t in range(T)], axis=0)

        # ---- embedding (Linear) + tanh over all T*B rows in one MXU call ---
        y = jnp.tanh(mm(x_tm, W("emb_w")) + Bv("emb_b"))          # (T*B, E) f32

        # ---- layer-0 input projection hoisted over ALL rows (one wide dot) -
        gi = mm(y, W("wih0")) + Bv("bih0")                        # (T*B, 3H)

        def gru_cell(gi_t, h, whh, bhh):
            gh = mm(h, whh) + bhh
            # fused r/z sigmoid: single EUP issue covering both gates
            s = jax.nn.sigmoid(gi_t[:, :2 * H] + gh[:, :2 * H])
            r, z = s[:, :H], s[:, H:]
            n = jnp.tanh(gi_t[:, 2 * H:] + r * gh[:, 2 * H:])     # b_hn inside r*(.)
            return (1.0 - z) * n + z * h

        # ---- LAYER-MAJOR recurrence (only h @ W_hh stays on the serial path)
        # TODO(synk): for large T/H replace the Python unroll with
        #             lax.fori_loop(..., unroll=k) to bound vreg pressure.
        h = None
        for l in range(num_layers):
            whh, bhh = W(f"whh{l}"), Bv(f"bhh{l}")
            last = (l == num_layers - 1)
            # per-step views of the precomputed gi (time-major rows t*B..t*B+B)
            steps = [gi[t * B:(t + 1) * B, :] for t in range(T)]
            h = jnp.zeros((B, H), f32)
            outs = []
            for t in range(T):
                h = gru_cell(steps[t], h, whh, bhh)
                if not last:
                    outs.append(h)
            if not last:
                # hoist the NEXT layer's input projection into ONE wide matmul
                h_seq = jnp.concatenate(outs, axis=0)             # (T*B, H)
                gi = mm(h_seq, W(f"wih{l + 1}")) + Bv(f"bih{l + 1}")

        # ---- MLP head on the final hidden state + sigmoid ------------------
        for i in range(num_linears - 1):
            pre = mm(h, W(f"lin{i}_w")) + Bv(f"lin{i}_b")
            # exact (erf) GELU — matches torch.nn.functional.gelu default
            h = 0.5 * pre * (1.0 + jax.lax.erf(pre * _INV_SQRT2))
        logit = mm(h, W(f"lin{num_linears - 1}_w")) + Bv(f"lin{num_linears - 1}_b")
        o_ref[...] = jax.nn.sigmoid(logit)

    return kernel


# ---------------------------------------------------------------------------
# Wrapper
# ---------------------------------------------------------------------------
def rnn_model_forward(x, packed):
    """Full forward pass. x: (B, T, D_in) float32 -> (B, 1) float32."""
    w_buf, b_buf, w_off, b_off, meta = packed
    B, T, _ = x.shape
    kernel = _make_fused_kernel(B, T, meta["H"], meta["num_layers"],
                                meta["num_linears"], w_off, b_off)
    # Single grid point: the whole model (<100 KB resident) is latency-bound
    # and VMEM-resident.  TODO(synk): for batched serving on v7x, add a
    # leading 'parallel' grid axis over batch so both TensorCores are used.
    return pl.pallas_call(
        kernel,
        out_shape=jax.ShapeDtypeStruct((B, 1), jnp.float32),
        in_specs=[pl.BlockSpec(memory_space=pltpu.MemorySpace.VMEM)] * 3,
        out_specs=pl.BlockSpec(memory_space=pltpu.MemorySpace.VMEM),
    )(x, w_buf, b_buf)


# ---------------------------------------------------------------------------
# Pure-JAX reference (same concatenated [r|z|n] gate layout).
# mxu_dtype controls the dot-operand dtype so the kernel's bf16-MXU numerics
# can be validated exactly, in addition to a looser full-f32 check.
# ---------------------------------------------------------------------------
def rnn_model_reference(x, params, mxu_dtype=jnp.float32):
    B, T, D_in = x.shape
    H = params["gru"][0]["whh"].shape[0]

    def dot(a, w):
        return jnp.dot(a.astype(mxu_dtype), w.astype(mxu_dtype),
                       preferred_element_type=jnp.float32)

    y = jnp.tanh(dot(x.reshape(B * T, D_in), params["emb_w"]) + params["emb_b"])
    seq = y.reshape(B, T, -1)
    for lp in params["gru"]:
        h = jnp.zeros((B, H), jnp.float32)
        outs = []
        for t in range(T):
            gi = dot(seq[:, t, :], lp["wih"]) + lp["bih"]
            gh = dot(h, lp["whh"]) + lp["bhh"]
            r = jax.nn.sigmoid(gi[:, :H] + gh[:, :H])
            z = jax.nn.sigmoid(gi[:, H:2 * H] + gh[:, H:2 * H])
            n = jnp.tanh(gi[:, 2 * H:] + r * gh[:, 2 * H:])
            h = (1.0 - z) * n + z * h
            outs.append(h)
        seq = jnp.stack(outs, axis=1)
    h = seq[:, -1, :]
    for (w, b) in params["linears"][:-1]:
        pre = dot(h, w) + b
        h = 0.5 * pre * (1.0 + jax.lax.erf(pre * _INV_SQRT2))
    w, b = params["linears"][-1]
    return jax.nn.sigmoid(dot(h, w) + b)


# ---------------------------------------------------------------------------
# Deterministic parameter init (gate-concatenated layout)
# ---------------------------------------------------------------------------
def make_params(key, d_in, emb_dim, hidden, num_layers, linear_sizes):
    def u(k, shape, scale):
        return jax.random.uniform(k, shape, jnp.float32, -scale, scale)

    keys = jax.random.split(key, 4 + num_layers)
    params = {}
    s_in = 1.0 / (d_in ** 0.5)
    params["emb_w"] = u(keys[0], (d_in, emb_dim), s_in)
    params["emb_b"] = u(keys[1], (1, emb_dim), s_in)

    gru = []
    for l in range(num_layers):
        d_l = emb_dim if l == 0 else hidden
        ks = jax.random.split(keys[2 + l], 4)
        s = 1.0 / (hidden ** 0.5)
        gru.append({
            # gate-concatenated layout: columns ordered [r | z | n]
            "wih": u(ks[0], (d_l, 3 * hidden), s),
            "whh": u(ks[1], (hidden, 3 * hidden), s),
            "bih": u(ks[2], (1, 3 * hidden), s),
            "bhh": u(ks[3], (1, 3 * hidden), s),
        })
    params["gru"] = gru

    sizes = [hidden] + linear_sizes + [1]
    lkeys = jax.random.split(keys[-1], 2 * (len(sizes) - 1))
    linears = []
    for i, (ins, outs) in enumerate(zip(sizes[:-1], sizes[1:])):
        s = 1.0 / (ins ** 0.5)
        linears.append((u(lkeys[2 * i], (ins, outs), s),
                        u(lkeys[2 * i + 1], (1, outs), s)))
    params["linears"] = linears
    return params


# ---------------------------------------------------------------------------
if __name__ == "__main__":
    B, T, D_in = 2, 8, 16
    EMB, HID, LAYERS = 32, 32, 2
    LINEAR_SIZES = [16]

    key = jax.random.PRNGKey(0)
    kx, kp = jax.random.split(key)
    x = jax.random.normal(kx, (B, T, D_in), jnp.float32)
    params = make_params(kp, D_in, EMB, HID, LAYERS, LINEAR_SIZES)
    packed = pack_params(params)   # one-time host-side packing; cache in real use

    out = jax.block_until_ready(rnn_model_forward(x, packed))
    ref_bf16 = jax.block_until_ready(rnn_model_reference(x, params, jnp.bfloat16))
    ref_f32 = jax.block_until_ready(rnn_model_reference(x, params, jnp.float32))

    assert out.shape == (B, 1), out.shape
    assert bool(jnp.all(jnp.isfinite(out)))
    # structural check vs a reference with identical bf16-MXU-operand numerics
    assert bool(jnp.allclose(out, ref_bf16, atol=1e-3, rtol=1e-3)), (out, ref_bf16)
    # end-to-end check vs the full-f32 reference (bf16 operand drift is small
    # for this 8-step, H=32 recurrence)
    assert bool(jnp.allclose(out, ref_f32, atol=2e-2, rtol=2e-2)), (out, ref_f32)

    print("KERNEL_OK")
</pallas_src>

<mosaic_0001>
module attributes {stable_mosaic.version = 11 : i64} {
  func.func @kernel(%arg0: memref<2x8x16xf32, #tpu.memory_space<vmem>>, %arg1: memref<192x128xbf16, #tpu.memory_space<vmem>>, %arg2: memref<8x128xf32, #tpu.memory_space<vmem>>, %arg3: memref<2x1xf32, #tpu.memory_space<vmem>>) attributes {dimension_semantics = [], scalar_prefetch = 0 : i64, scratch_operands = 0 : i64, tpu.core_type = #tpu.core_type<tc>} {
    %c0 = arith.constant 0 : index
    %c0_0 = arith.constant 0 : index
    %c0_1 = arith.constant 0 : index
    %0 = vector.load %arg0[%c0, %c0_0, %c0_1] : memref<2x8x16xf32, #tpu.memory_space<vmem>>, vector<2x1x16xf32>
    %1 = vector.shape_cast %0 : vector<2x1x16xf32> to vector<2x16xf32>
    %c0_2 = arith.constant 0 : index
    %c1 = arith.constant 1 : index
    %c0_3 = arith.constant 0 : index
    %2 = vector.load %arg0[%c0_2, %c1, %c0_3] : memref<2x8x16xf32, #tpu.memory_space<vmem>>, vector<2x1x16xf32>
    %3 = vector.shape_cast %2 : vector<2x1x16xf32> to vector<2x16xf32>
    %c0_4 = arith.constant 0 : index
    %c2 = arith.constant 2 : index
    %c0_5 = arith.constant 0 : index
    %4 = vector.load %arg0[%c0_4, %c2, %c0_5] : memref<2x8x16xf32, #tpu.memory_space<vmem>>, vector<2x1x16xf32>
    %5 = vector.shape_cast %4 : vector<2x1x16xf32> to vector<2x16xf32>
    %c0_6 = arith.constant 0 : index
    %c3 = arith.constant 3 : index
    %c0_7 = arith.constant 0 : index
    %6 = vector.load %arg0[%c0_6, %c3, %c0_7] : memref<2x8x16xf32, #tpu.memory_space<vmem>>, vector<2x1x16xf32>
    %7 = vector.shape_cast %6 : vector<2x1x16xf32> to vector<2x16xf32>
    %c0_8 = arith.constant 0 : index
    %c4 = arith.constant 4 : index
    %c0_9 = arith.constant 0 : index
    %8 = vector.load %arg0[%c0_8, %c4, %c0_9] : memref<2x8x16xf32, #tpu.memory_space<vmem>>, vector<2x1x16xf32>
    %9 = vector.shape_cast %8 : vector<2x1x16xf32> to vector<2x16xf32>
    %c0_10 = arith.constant 0 : index
    %c5 = arith.constant 5 : index
    %c0_11 = arith.constant 0 : index
    %10 = vector.load %arg0[%c0_10, %c5, %c0_11] : memref<2x8x16xf32, #tpu.memory_space<vmem>>, vector<2x1x16xf32>
    %11 = vector.shape_cast %10 : vector<2x1x16xf32> to vector<2x16xf32>
    %c0_12 = arith.constant 0 : index
    %c6 = arith.constant 6 : index
    %c0_13 = arith.constant 0 : index
    %12 = vector.load %arg0[%c0_12, %c6, %c0_13] : memref<2x8x16xf32, #tpu.memory_space<vmem>>, vector<2x1x16xf32>
    %13 = vector.shape_cast %12 : vector<2x1x16xf32> to vector<2x16xf32>
    %c0_14 = arith.constant 0 : index
    %c7 = arith.constant 7 : index
    %c0_15 = arith.constant 0 : index
    %14 = vector.load %arg0[%c0_14, %c7, %c0_15] : memref<2x8x16xf32, #tpu.memory_space<vmem>>, vector<2x1x16xf32>
    %15 = vector.shape_cast %14 : vector<2x1x16xf32> to vector<2x16xf32>
    %16 = tpu.concatenate %1, %3, %5, %7, %9, %11, %13, %15 in 0 : vector<2x16xf32>, vector<2x16xf32>, vector<2x16xf32>, vector<2x16xf32>, vector<2x16xf32>, vector<2x16xf32>, vector<2x16xf32>, vector<2x16xf32> -> vector<16x16xf32>
    %c0_16 = arith.constant 0 : index
    %c0_17 = arith.constant 0 : index
    %17 = vector.load %arg1[%c0_16, %c0_17] : memref<192x128xbf16, #tpu.memory_space<vmem>>, vector<16x32xbf16>
    %18 = arith.truncf %16 : vector<16x16xf32> to vector<16x16xbf16>
    %cst = arith.constant dense<0.000000e+00> : vector<16x32xf32>
    %19 = tpu.matmul %18, %17, %cst {dimension_numbers = #tpu.dot_dimension_numbers<[1], [0], [0], [1], [0, 0, 1, 1], [], []>} : vector<16x16xbf16>, vector<16x32xbf16>, vector<16x32xf32> -> vector<16x32xf32>
    %c0_18 = arith.constant 0 : index
    %c0_19 = arith.constant 0 : index
    %20 = vector.load %arg2[%c0_18, %c0_19] : memref<8x128xf32, #tpu.memory_space<vmem>>, vector<1x32xf32>
    %21 = vector.broadcast %20 : vector<1x32xf32> to vector<16x32xf32>
    %22 = arith.addf %19, %21 : vector<16x32xf32>
    %23 = math.tanh %22 : vector<16x32xf32>
    %c16 = arith.constant 16 : index
    %c0_20 = arith.constant 0 : index
    %24 = vector.load %arg1[%c16, %c0_20] : memref<192x128xbf16, #tpu.memory_space<vmem>>, vector<32x96xbf16>
    %25 = arith.truncf %23 : vector<16x32xf32> to vector<16x32xbf16>
    %cst_21 = arith.constant dense<0.000000e+00> : vector<16x96xf32>
    %26 = tpu.matmul %25, %24, %cst_21 {dimension_numbers = #tpu.dot_dimension_numbers<[1], [0], [0], [1], [0, 0, 1, 1], [], []>} : vector<16x32xbf16>, vector<32x96xbf16>, vector<16x96xf32> -> vector<16x96xf32>
    %c1_22 = arith.constant 1 : index
    %c0_23 = arith.constant 0 : index
    %27 = vector.load %arg2[%c1_22, %c0_23] : memref<8x128xf32, #tpu.memory_space<vmem>>, vector<1x96xf32>
    %28 = vector.broadcast %27 : vector<1x96xf32> to vector<16x96xf32>
    %29 = arith.addf %26, %28 : vector<16x96xf32>
    %c48 = arith.constant 48 : index
    %c0_24 = arith.constant 0 : index
    %30 = vector.load %arg1[%c48, %c0_24] : memref<192x128xbf16, #tpu.memory_space<vmem>>, vector<32x96xbf16>
    %c2_25 = arith.constant 2 : index
    %c0_26 = arith.constant 0 : index
    %31 = vector.load %arg2[%c2_25, %c0_26] : memref<8x128xf32, #tpu.memory_space<vmem>>, vector<1x96xf32>
    %32 = vector.extract_strided_slice %29 {offsets = [0, 0], sizes = [2, 96], strides = [1, 1]} : vector<16x96xf32> to vector<2x96xf32>
    %33 = vector.extract_strided_slice %29 {offsets = [2, 0], sizes = [2, 96], strides = [1, 1]} : vector<16x96xf32> to vector<2x96xf32>
    %34 = vector.extract_strided_slice %29 {offsets = [4, 0], sizes = [2, 96], strides = [1, 1]} : vector<16x96xf32> to vector<2x96xf32>
    %35 = vector.extract_strided_slice %29 {offsets = [6, 0], sizes = [2, 96], strides = [1, 1]} : vector<16x96xf32> to vector<2x96xf32>
    %36 = vector.extract_strided_slice %29 {offsets = [8, 0], sizes = [2, 96], strides = [1, 1]} : vector<16x96xf32> to vector<2x96xf32>
    %37 = vector.extract_strided_slice %29 {offsets = [10, 0], sizes = [2, 96], strides = [1, 1]} : vector<16x96xf32> to vector<2x96xf32>
    %38 = vector.extract_strided_slice %29 {offsets = [12, 0], sizes = [2, 96], strides = [1, 1]} : vector<16x96xf32> to vector<2x96xf32>
    %39 = vector.extract_strided_slice %29 {offsets = [14, 0], sizes = [2, 96], strides = [1, 1]} : vector<16x96xf32> to vector<2x96xf32>
    %cst_27 = arith.constant 0.000000e+00 : f32
    %40 = vector.broadcast %cst_27 : f32 to vector<2x32xf32>
    %41 = arith.truncf %40 : vector<2x32xf32> to vector<2x32xbf16>
    %cst_28 = arith.constant dense<0.000000e+00> : vector<2x96xf32>
    %42 = tpu.matmul %41, %30, %cst_28 {dimension_numbers = #tpu.dot_dimension_numbers<[1], [0], [0], [1], [0, 0, 1, 1], [], []>} : vector<2x32xbf16>, vector<32x96xbf16>, vector<2x96xf32> -> vector<2x96xf32>
    %43 = vector.broadcast %31 : vector<1x96xf32> to vector<2x96xf32>
    %44 = arith.addf %42, %43 : vector<2x96xf32>
    %45 = vector.extract_strided_slice %32 {offsets = [0, 0], sizes = [2, 64], strides = [1, 1]} : vector<2x96xf32> to vector<2x64xf32>
    %46 = vector.extract_strided_slice %44 {offsets = [0, 0], sizes = [2, 64], strides = [1, 1]} : vector<2x96xf32> to vector<2x64xf32>
    %47 = arith.addf %45, %46 : vector<2x64xf32>
    %48 = arith.negf %47 : vector<2x64xf32>
    %49 = math.exp %48 : vector<2x64xf32>
    %cst_29 = arith.constant 1.000000e+00 : f32
    %50 = vector.broadcast %cst_29 : f32 to vector<2x64xf32>
    %51 = arith.addf %50, %49 : vector<2x64xf32>
    %52 = arith.divf %50, %51 : vector<2x64xf32>
    %53 = vector.extract_strided_slice %52 {offsets = [0, 0], sizes = [2, 32], strides = [1, 1]} : vector<2x64xf32> to vector<2x32xf32>
    %54 = vector.extract_strided_slice %52 {offsets = [0, 32], sizes = [2, 32], strides = [1, 1]} : vector<2x64xf32> to vector<2x32xf32>
    %55 = vector.extract_strided_slice %32 {offsets = [0, 64], sizes = [2, 32], strides = [1, 1]} : vector<2x96xf32> to vector<2x32xf32>
    %56 = vector.extract_strided_slice %44 {offsets = [0, 64], sizes = [2, 32], strides = [1, 1]} : vector<2x96xf32> to vector<2x32xf32>
    %57 = arith.mulf %53, %56 : vector<2x32xf32>
    %58 = arith.addf %55, %57 : vector<2x32xf32>
    %59 = math.tanh %58 : vector<2x32xf32>
    %cst_30 = arith.constant 1.000000e+00 : f32
    %60 = vector.broadcast %cst_30 : f32 to vector<2x32xf32>
    %61 = arith.subf %60, %54 : vector<2x32xf32>
    %62 = arith.mulf %61, %59 : vector<2x32xf32>
    %63 = arith.mulf %54, %40 : vector<2x32xf32>
    %64 = arith.addf %62, %63 : vector<2x32xf32>
    %65 = arith.truncf %64 : vector<2x32xf32> to vector<2x32xbf16>
    %cst_31 = arith.constant dense<0.000000e+00> : vector<2x96xf32>
    %66 = tpu.matmul %65, %30, %cst_31 {dimension_numbers = #tpu.dot_dimension_numbers<[1], [0], [0], [1], [0, 0, 1, 1], [], []>} : vector<2x32xbf16>, vector<32x96xbf16>, vector<2x96xf32> -> vector<2x96xf32>
    %67 = vector.broadcast %31 : vector<1x96xf32> to vector<2x96xf32>
    %68 = arith.addf %66, %67 : vector<2x96xf32>
    %69 = vector.extract_strided_slice %33 {offsets = [0, 0], sizes = [2, 64], strides = [1, 1]} : vector<2x96xf32> to vector<2x64xf32>
    %70 = vector.extract_strided_slice %68 {offsets = [0, 0], sizes = [2, 64], strides = [1, 1]} : vector<2x96xf32> to vector<2x64xf32>
    %71 = arith.addf %69, %70 : vector<2x64xf32>
    %72 = arith.negf %71 : vector<2x64xf32>
    %73 = math.exp %72 : vector<2x64xf32>
    %cst_32 = arith.constant 1.000000e+00 : f32
    %74 = vector.broadcast %cst_32 : f32 to vector<2x64xf32>
    %75 = arith.addf %74, %73 : vector<2x64xf32>
    %76 = arith.divf %74, %75 : vector<2x64xf32>
    %77 = vector.extract_strided_slice %76 {offsets = [0, 0], sizes = [2, 32], strides = [1, 1]} : vector<2x64xf32> to vector<2x32xf32>
    %78 = vector.extract_strided_slice %76 {offsets = [0, 32], sizes = [2, 32], strides = [1, 1]} : vector<2x64xf32> to vector<2x32xf32>
    %79 = vector.extract_strided_slice %33 {offsets = [0, 64], sizes = [2, 32], strides = [1, 1]} : vector<2x96xf32> to vector<2x32xf32>
    %80 = vector.extract_strided_slice %68 {offsets = [0, 64], sizes = [2, 32], strides = [1, 1]} : vector<2x96xf32> to vector<2x32xf32>
    %81 = arith.mulf %77, %80 : vector<2x32xf32>
    %82 = arith.addf %79, %81 : vector<2x32xf32>
    %83 = math.tanh %82 : vector<2x32xf32>
    %cst_33 = arith.constant 1.000000e+00 : f32
    %84 = vector.broadcast %cst_33 : f32 to vector<2x32xf32>
    %85 = arith.subf %84, %78 : vector<2x32xf32>
    %86 = arith.mulf %85, %83 : vector<2x32xf32>
    %87 = arith.mulf %78, %64 : vector<2x32xf32>
    %88 = arith.addf %86, %87 : vector<2x32xf32>
    %89 = arith.truncf %88 : vector<2x32xf32> to vector<2x32xbf16>
    %cst_34 = arith.constant dense<0.000000e+00> : vector<2x96xf32>
    %90 = tpu.matmul %89, %30, %cst_34 {dimension_numbers = #tpu.dot_dimension_numbers<[1], [0], [0], [1], [0, 0, 1, 1], [], []>} : vector<2x32xbf16>, vector<32x96xbf16>, vector<2x96xf32> -> vector<2x96xf32>
    %91 = vector.broadcast %31 : vector<1x96xf32> to vector<2x96xf32>
    %92 = arith.addf %90, %91 : vector<2x96xf32>
    %93 = vector.extract_strided_slice %34 {offsets = [0, 0], sizes = [2, 64], strides = [1, 1]} : vector<2x96xf32> to vector<2x64xf32>
    %94 = vector.extract_strided_slice %92 {offsets = [0, 0], sizes = [2, 64], strides = [1, 1]} : vector<2x96xf32> to vector<2x64xf32>
    %95 = arith.addf %93, %94 : vector<2x64xf32>
    %96 = arith.negf %95 : vector<2x64xf32>
    %97 = math.exp %96 : vector<2x64xf32>
    %cst_35 = arith.constant 1.000000e+00 : f32
    %98 = vector.broadcast %cst_35 : f32 to vector<2x64xf32>
    %99 = arith.addf %98, %97 : vector<2x64xf32>
    %100 = arith.divf %98, %99 : vector<2x64xf32>
    %101 = vector.extract_strided_slice %100 {offsets = [0, 0], sizes = [2, 32], strides = [1, 1]} : vector<2x64xf32> to vector<2x32xf32>
    %102 = vector.extract_strided_slice %100 {offsets = [0, 32], sizes = [2, 32], strides = [1, 1]} : vector<2x64xf32> to vector<2x32xf32>
    %103 = vector.extract_strided_slice %34 {offsets = [0, 64], sizes = [2, 32], strides = [1, 1]} : vector<2x96xf32> to vector<2x32xf32>
    %104 = vector.extract_strided_slice %92 {offsets = [0, 64], sizes = [2, 32], strides = [1, 1]} : vector<2x96xf32> to vector<2x32xf32>
    %105 = arith.mulf %101, %104 : vector<2x32xf32>
    %106 = arith.addf %103, %105 : vector<2x32xf32>
    %107 = math.tanh %106 : vector<2x32xf32>
    %cst_36 = arith.constant 1.000000e+00 : f32
    %108 = vector.broadcast %cst_36 : f32 to vector<2x32xf32>
    %109 = arith.subf %108, %102 : vector<2x32xf32>
    %110 = arith.mulf %109, %107 : vector<2x32xf32>
    %111 = arith.mulf %102, %88 : vector<2x32xf32>
    %112 = arith.addf %110, %111 : vector<2x32xf32>
    %113 = arith.truncf %112 : vector<2x32xf32> to vector<2x32xbf16>
    %cst_37 = arith.constant dense<0.000000e+00> : vector<2x96xf32>
    %114 = tpu.matmul %113, %30, %cst_37 {dimension_numbers = #tpu.dot_dimension_numbers<[1], [0], [0], [1], [0, 0, 1, 1], [], []>} : vector<2x32xbf16>, vector<32x96xbf16>, vector<2x96xf32> -> vector<2x96xf32>
    %115 = vector.broadcast %31 : vector<1x96xf32> to vector<2x96xf32>
    %116 = arith.addf %114, %115 : vector<2x96xf32>
    %117 = vector.extract_strided_slice %35 {offsets = [0, 0], sizes = [2, 64], strides = [1, 1]} : vector<2x96xf32> to vector<2x64xf32>
    %118 = vector.extract_strided_slice %116 {offsets = [0, 0], sizes = [2, 64], strides = [1, 1]} : vector<2x96xf32> to vector<2x64xf32>
    %119 = arith.addf %117, %118 : vector<2x64xf32>
    %120 = arith.negf %119 : vector<2x64xf32>
    %121 = math.exp %120 : vector<2x64xf32>
    %cst_38 = arith.constant 1.000000e+00 : f32
    %122 = vector.broadcast %cst_38 : f32 to vector<2x64xf32>
    %123 = arith.addf %122, %121 : vector<2x64xf32>
    %124 = arith.divf %122, %123 : vector<2x64xf32>
    %125 = vector.extract_strided_slice %124 {offsets = [0, 0], sizes = [2, 32], strides = [1, 1]} : vector<2x64xf32> to vector<2x32xf32>
    %126 = vector.extract_strided_slice %124 {offsets = [0, 32], sizes = [2, 32], strides = [1, 1]} : vector<2x64xf32> to vector<2x32xf32>
    %127 = vector.extract_strided_slice %35 {offsets = [0, 64], sizes = [2, 32], strides = [1, 1]} : vector<2x96xf32> to vector<2x32xf32>
    %128 = vector.extract_strided_slice %116 {offsets = [0, 64], sizes = [2, 32], strides = [1, 1]} : vector<2x96xf32> to vector<2x32xf32>
    %129 = arith.mulf %125, %128 : vector<2x32xf32>
    %130 = arith.addf %127, %129 : vector<2x32xf32>
    %131 = math.tanh %130 : vector<2x32xf32>
    %cst_39 = arith.constant 1.000000e+00 : f32
    %132 = vector.broadcast %cst_39 : f32 to vector<2x32xf32>
    %133 = arith.subf %132, %126 : vector<2x32xf32>
    %134 = arith.mulf %133, %131 : vector<2x32xf32>
    %135 = arith.mulf %126, %112 : vector<2x32xf32>
    %136 = arith.addf %134, %135 : vector<2x32xf32>
    %137 = arith.truncf %136 : vector<2x32xf32> to vector<2x32xbf16>
    %cst_40 = arith.constant dense<0.000000e+00> : vector<2x96xf32>
    %138 = tpu.matmul %137, %30, %cst_40 {dimension_numbers = #tpu.dot_dimension_numbers<[1], [0], [0], [1], [0, 0, 1, 1], [], []>} : vector<2x32xbf16>, vector<32x96xbf16>, vector<2x96xf32> -> vector<2x96xf32>
    %139 = vector.broadcast %31 : vector<1x96xf32> to vector<2x96xf32>
    %140 = arith.addf %138, %139 : vector<2x96xf32>
    %141 = vector.extract_strided_slice %36 {offsets = [0, 0], sizes = [2, 64], strides = [1, 1]} : vector<2x96xf32> to vector<2x64xf32>
    %142 = vector.extract_strided_slice %140 {offsets = [0, 0], sizes = [2, 64], strides = [1, 1]} : vector<2x96xf32> to vector<2x64xf32>
    %143 = arith.addf %141, %142 : vector<2x64xf32>
    %144 = arith.negf %143 : vector<2x64xf32>
    %145 = math.exp %144 : vector<2x64xf32>
    %cst_41 = arith.constant 1.000000e+00 : f32
    %146 = vector.broadcast %cst_41 : f32 to vector<2x64xf32>
    %147 = arith.addf %146, %145 : vector<2x64xf32>
    %148 = arith.divf %146, %147 : vector<2x64xf32>
    %149 = vector.extract_strided_slice %148 {offsets = [0, 0], sizes = [2, 32], strides = [1, 1]} : vector<2x64xf32> to vector<2x32xf32>
    %150 = vector.extract_strided_slice %148 {offsets = [0, 32], sizes = [2, 32], strides = [1, 1]} : vector<2x64xf32> to vector<2x32xf32>
    %151 = vector.extract_strided_slice %36 {offsets = [0, 64], sizes = [2, 32], strides = [1, 1]} : vector<2x96xf32> to vector<2x32xf32>
    %152 = vector.extract_strided_slice %140 {offsets = [0, 64], sizes = [2, 32], strides = [1, 1]} : vector<2x96xf32> to vector<2x32xf32>
    %153 = arith.mulf %149, %152 : vector<2x32xf32>
    %154 = arith.addf %151, %153 : vector<2x32xf32>
    %155 = math.tanh %154 : vector<2x32xf32>
    %cst_42 = arith.constant 1.000000e+00 : f32
    %156 = vector.broadcast %cst_42 : f32 to vector<2x32xf32>
    %157 = arith.subf %156, %150 : vector<2x32xf32>
    %158 = arith.mulf %157, %155 : vector<2x32xf32>
    %159 = arith.mulf %150, %136 : vector<2x32xf32>
    %160 = arith.addf %158, %159 : vector<2x32xf32>
    %161 = arith.truncf %160 : vector<2x32xf32> to vector<2x32xbf16>
    %cst_43 = arith.constant dense<0.000000e+00> : vector<2x96xf32>
    %162 = tpu.matmul %161, %30, %cst_43 {dimension_numbers = #tpu.dot_dimension_numbers<[1], [0], [0], [1], [0, 0, 1, 1], [], []>} : vector<2x32xbf16>, vector<32x96xbf16>, vector<2x96xf32> -> vector<2x96xf32>
    %163 = vector.broadcast %31 : vector<1x96xf32> to vector<2x96xf32>
    %164 = arith.addf %162, %163 : vector<2x96xf32>
    %165 = vector.extract_strided_slice %37 {offsets = [0, 0], sizes = [2, 64], strides = [1, 1]} : vector<2x96xf32> to vector<2x64xf32>
    %166 = vector.extract_strided_slice %164 {offsets = [0, 0], sizes = [2, 64], strides = [1, 1]} : vector<2x96xf32> to vector<2x64xf32>
    %167 = arith.addf %165, %166 : vector<2x64xf32>
    %168 = arith.negf %167 : vector<2x64xf32>
    %169 = math.exp %168 : vector<2x64xf32>
    %cst_44 = arith.constant 1.000000e+00 : f32
    %170 = vector.broadcast %cst_44 : f32 to vector<2x64xf32>
    %171 = arith.addf %170, %169 : vector<2x64xf32>
    %172 = arith.divf %170, %171 : vector<2x64xf32>
    %173 = vector.extract_strided_slice %172 {offsets = [0, 0], sizes = [2, 32], strides = [1, 1]} : vector<2x64xf32> to vector<2x32xf32>
    %174 = vector.extract_strided_slice %172 {offsets = [0, 32], sizes = [2, 32], strides = [1, 1]} : vector<2x64xf32> to vector<2x32xf32>
    %175 = vector.extract_strided_slice %37 {offsets = [0, 64], sizes = [2, 32], strides = [1, 1]} : vector<2x96xf32> to vector<2x32xf32>
    %176 = vector.extract_strided_slice %164 {offsets = [0, 64], sizes = [2, 32], strides = [1, 1]} : vector<2x96xf32> to vector<2x32xf32>
    %177 = arith.mulf %173, %176 : vector<2x32xf32>
    %178 = arith.addf %175, %177 : vector<2x32xf32>
    %179 = math.tanh %178 : vector<2x32xf32>
    %cst_45 = arith.constant 1.000000e+00 : f32
    %180 = vector.broadcast %cst_45 : f32 to vector<2x32xf32>
    %181 = arith.subf %180, %174 : vector<2x32xf32>
    %182 = arith.mulf %181, %179 : vector<2x32xf32>
    %183 = arith.mulf %174, %160 : vector<2x32xf32>
    %184 = arith.addf %182, %183 : vector<2x32xf32>
    %185 = arith.truncf %184 : vector<2x32xf32> to vector<2x32xbf16>
    %cst_46 = arith.constant dense<0.000000e+00> : vector<2x96xf32>
    %186 = tpu.matmul %185, %30, %cst_46 {dimension_numbers = #tpu.dot_dimension_numbers<[1], [0], [0], [1], [0, 0, 1, 1], [], []>} : vector<2x32xbf16>, vector<32x96xbf16>, vector<2x96xf32> -> vector<2x96xf32>
    %187 = vector.broadcast %31 : vector<1x96xf32> to vector<2x96xf32>
    %188 = arith.addf %186, %187 : vector<2x96xf32>
    %189 = vector.extract_strided_slice %38 {offsets = [0, 0], sizes = [2, 64], strides = [1, 1]} : vector<2x96xf32> to vector<2x64xf32>
    %190 = vector.extract_strided_slice %188 {offsets = [0, 0], sizes = [2, 64], strides = [1, 1]} : vector<2x96xf32> to vector<2x64xf32>
    %191 = arith.addf %189, %190 : vector<2x64xf32>
    %192 = arith.negf %191 : vector<2x64xf32>
    %193 = math.exp %192 : vector<2x64xf32>
    %cst_47 = arith.constant 1.000000e+00 : f32
    %194 = vector.broadcast %cst_47 : f32 to vector<2x64xf32>
    %195 = arith.addf %194, %193 : vector<2x64xf32>
    %196 = arith.divf %194, %195 : vector<2x64xf32>
    %197 = vector.extract_strided_slice %196 {offsets = [0, 0], sizes = [2, 32], strides = [1, 1]} : vector<2x64xf32> to vector<2x32xf32>
    %198 = vector.extract_strided_slice %196 {offsets = [0, 32], sizes = [2, 32], strides = [1, 1]} : vector<2x64xf32> to vector<2x32xf32>
    %199 = vector.extract_strided_slice %38 {offsets = [0, 64], sizes = [2, 32], strides = [1, 1]} : vector<2x96xf32> to vector<2x32xf32>
    %200 = vector.extract_strided_slice %188 {offsets = [0, 64], sizes = [2, 32], strides = [1, 1]} : vector<2x96xf32> to vector<2x32xf32>
    %201 = arith.mulf %197, %200 : vector<2x32xf32>
    %202 = arith.addf %199, %201 : vector<2x32xf32>
    %203 = math.tanh %202 : vector<2x32xf32>
    %cst_48 = arith.constant 1.000000e+00 : f32
    %204 = vector.broadcast %cst_48 : f32 to vector<2x32xf32>
    %205 = arith.subf %204, %198 : vector<2x32xf32>
    %206 = arith.mulf %205, %203 : vector<2x32xf32>
    %207 = arith.mulf %198, %184 : vector<2x32xf32>
    %208 = arith.addf %206, %207 : vector<2x32xf32>
    %209 = arith.truncf %208 : vector<2x32xf32> to vector<2x32xbf16>
    %cst_49 = arith.constant dense<0.000000e+00> : vector<2x96xf32>
    %210 = tpu.matmul %209, %30, %cst_49 {dimension_numbers = #tpu.dot_dimension_numbers<[1], [0], [0], [1], [0, 0, 1, 1], [], []>} : vector<2x32xbf16>, vector<32x96xbf16>, vector<2x96xf32> -> vector<2x96xf32>
    %211 = vector.broadcast %31 : vector<1x96xf32> to vector<2x96xf32>
    %212 = arith.addf %210, %211 : vector<2x96xf32>
    %213 = vector.extract_strided_slice %39 {offsets = [0, 0], sizes = [2, 64], strides = [1, 1]} : vector<2x96xf32> to vector<2x64xf32>
    %214 = vector.extract_strided_slice %212 {offsets = [0, 0], sizes = [2, 64], strides = [1, 1]} : vector<2x96xf32> to vector<2x64xf32>
    %215 = arith.addf %213, %214 : vector<2x64xf32>
    %216 = arith.negf %215 : vector<2x64xf32>
    %217 = math.exp %216 : vector<2x64xf32>
    %cst_50 = arith.constant 1.000000e+00 : f32
    %218 = vector.broadcast %cst_50 : f32 to vector<2x64xf32>
    %219 = arith.addf %218, %217 : vector<2x64xf32>
    %220 = arith.divf %218, %219 : vector<2x64xf32>
    %221 = vector.extract_strided_slice %220 {offsets = [0, 0], sizes = [2, 32], strides = [1, 1]} : vector<2x64xf32> to vector<2x32xf32>
    %222 = vector.extract_strided_slice %220 {offsets = [0, 32], sizes = [2, 32], strides = [1, 1]} : vector<2x64xf32> to vector<2x32xf32>
    %223 = vector.extract_strided_slice %39 {offsets = [0, 64], sizes = [2, 32], strides = [1, 1]} : vector<2x96xf32> to vector<2x32xf32>
    %224 = vector.extract_strided_slice %212 {offsets = [0, 64], sizes = [2, 32], strides = [1, 1]} : vector<2x96xf32> to vector<2x32xf32>
    %225 = arith.mulf %221, %224 : vector<2x32xf32>
    %226 = arith.addf %223, %225 : vector<2x32xf32>
    %227 = math.tanh %226 : vector<2x32xf32>
    %cst_51 = arith.constant 1.000000e+00 : f32
    %228 = vector.broadcast %cst_51 : f32 to vector<2x32xf32>
    %229 = arith.subf %228, %222 : vector<2x32xf32>
    %230 = arith.mulf %229, %227 : vector<2x32xf32>
    %231 = arith.mulf %222, %208 : vector<2x32xf32>
    %232 = arith.addf %230, %231 : vector<2x32xf32>
    %233 = tpu.concatenate %64, %88, %112, %136, %160, %184, %208, %232 in 0 : vector<2x32xf32>, vector<2x32xf32>, vector<2x32xf32>, vector<2x32xf32>, vector<2x32xf32>, vector<2x32xf32>, vector<2x32xf32>, vector<2x32xf32> -> vector<16x32xf32>
    %c80 = arith.constant 80 : index
    %c0_52 = arith.constant 0 : index
    %234 = vector.load %arg1[%c80, %c0_52] : memref<192x128xbf16, #tpu.memory_space<vmem>>, vector<32x96xbf16>
    %235 = arith.truncf %233 : vector<16x32xf32> to vector<16x32xbf16>
    %cst_53 = arith.constant dense<0.000000e+00> : vector<16x96xf32>
    %236 = tpu.matmul %235, %234, %cst_53 {dimension_numbers = #tpu.dot_dimension_numbers<[1], [0], [0], [1], [0, 0, 1, 1], [], []>} : vector<16x32xbf16>, vector<32x96xbf16>, vector<16x96xf32> -> vector<16x96xf32>
    %c3_54 = arith.constant 3 : index
    %c0_55 = arith.constant 0 : index
    %237 = vector.load %arg2[%c3_54, %c0_55] : memref<8x128xf32, #tpu.memory_space<vmem>>, vector<1x96xf32>
    %238 = vector.broadcast %237 : vector<1x96xf32> to vector<16x96xf32>
    %239 = arith.addf %236, %238 : vector<16x96xf32>
    %c112 = arith.constant 112 : index
    %c0_56 = arith.constant 0 : index
    %240 = vector.load %arg1[%c112, %c0_56] : memref<192x128xbf16, #tpu.memory_space<vmem>>, vector<32x96xbf16>
    %c4_57 = arith.constant 4 : index
    %c0_58 = arith.constant 0 : index
    %241 = vector.load %arg2[%c4_57, %c0_58] : memref<8x128xf32, #tpu.memory_space<vmem>>, vector<1x96xf32>
    %242 = vector.extract_strided_slice %239 {offsets = [0, 0], sizes = [2, 96], strides = [1, 1]} : vector<16x96xf32> to vector<2x96xf32>
    %243 = vector.extract_strided_slice %239 {offsets = [2, 0], sizes = [2, 96], strides = [1, 1]} : vector<16x96xf32> to vector<2x96xf32>
    %244 = vector.extract_strided_slice %239 {offsets = [4, 0], sizes = [2, 96], strides = [1, 1]} : vector<16x96xf32> to vector<2x96xf32>
    %245 = vector.extract_strided_slice %239 {offsets = [6, 0], sizes = [2, 96], strides = [1, 1]} : vector<16x96xf32> to vector<2x96xf32>
    %246 = vector.extract_strided_slice %239 {offsets = [8, 0], sizes = [2, 96], strides = [1, 1]} : vector<16x96xf32> to vector<2x96xf32>
    %247 = vector.extract_strided_slice %239 {offsets = [10, 0], sizes = [2, 96], strides = [1, 1]} : vector<16x96xf32> to vector<2x96xf32>
    %248 = vector.extract_strided_slice %239 {offsets = [12, 0], sizes = [2, 96], strides = [1, 1]} : vector<16x96xf32> to vector<2x96xf32>
    %249 = vector.extract_strided_slice %239 {offsets = [14, 0], sizes = [2, 96], strides = [1, 1]} : vector<16x96xf32> to vector<2x96xf32>
    %cst_59 = arith.constant 0.000000e+00 : f32
    %250 = vector.broadcast %cst_59 : f32 to vector<2x32xf32>
    %251 = arith.truncf %250 : vector<2x32xf32> to vector<2x32xbf16>
    %cst_60 = arith.constant dense<0.000000e+00> : vector<2x96xf32>
    %252 = tpu.matmul %251, %240, %cst_60 {dimension_numbers = #tpu.dot_dimension_numbers<[1], [0], [0], [1], [0, 0, 1, 1], [], []>} : vector<2x32xbf16>, vector<32x96xbf16>, vector<2x96xf32> -> vector<2x96xf32>
    %253 = vector.broadcast %241 : vector<1x96xf32> to vector<2x96xf32>
    %254 = arith.addf %252, %253 : vector<2x96xf32>
    %255 = vector.extract_strided_slice %242 {offsets = [0, 0], sizes = [2, 64], strides = [1, 1]} : vector<2x96xf32> to vector<2x64xf32>
    %256 = vector.extract_strided_slice %254 {offsets = [0, 0], sizes = [2, 64], strides = [1, 1]} : vector<2x96xf32> to vector<2x64xf32>
    %257 = arith.addf %255, %256 : vector<2x64xf32>
    %258 = arith.negf %257 : vector<2x64xf32>
    %259 = math.exp %258 : vector<2x64xf32>
    %cst_61 = arith.constant 1.000000e+00 : f32
    %260 = vector.broadcast %cst_61 : f32 to vector<2x64xf32>
    %261 = arith.addf %260, %259 : vector<2x64xf32>
    %262 = arith.divf %260, %261 : vector<2x64xf32>
    %263 = vector.extract_strided_slice %262 {offsets = [0, 0], sizes = [2, 32], strides = [1, 1]} : vector<2x64xf32> to vector<2x32xf32>
    %264 = vector.extract_strided_slice %262 {offsets = [0, 32], sizes = [2, 32], strides = [1, 1]} : vector<2x64xf32> to vector<2x32xf32>
    %265 = vector.extract_strided_slice %242 {offsets = [0, 64], sizes = [2, 32], strides = [1, 1]} : vector<2x96xf32> to vector<2x32xf32>
    %266 = vector.extract_strided_slice %254 {offsets = [0, 64], sizes = [2, 32], strides = [1, 1]} : vector<2x96xf32> to vector<2x32xf32>
    %267 = arith.mulf %263, %266 : vector<2x32xf32>
    %268 = arith.addf %265, %267 : vector<2x32xf32>
    %269 = math.tanh %268 : vector<2x32xf32>
    %cst_62 = arith.constant 1.000000e+00 : f32
    %270 = vector.broadcast %cst_62 : f32 to vector<2x32xf32>
    %271 = arith.subf %270, %264 : vector<2x32xf32>
    %272 = arith.mulf %271, %269 : vector<2x32xf32>
    %273 = arith.mulf %264, %250 : vector<2x32xf32>
    %274 = arith.addf %272, %273 : vector<2x32xf32>
    %275 = arith.truncf %274 : vector<2x32xf32> to vector<2x32xbf16>
    %cst_63 = arith.constant dense<0.000000e+00> : vector<2x96xf32>
    %276 = tpu.matmul %275, %240, %cst_63 {dimension_numbers = #tpu.dot_dimension_numbers<[1], [0], [0], [1], [0, 0, 1, 1], [], []>} : vector<2x32xbf16>, vector<32x96xbf16>, vector<2x96xf32> -> vector<2x96xf32>
    %277 = vector.broadcast %241 : vector<1x96xf32> to vector<2x96xf32>
    %278 = arith.addf %276, %277 : vector<2x96xf32>
    %279 = vector.extract_strided_slice %243 {offsets = [0, 0], sizes = [2, 64], strides = [1, 1]} : vector<2x96xf32> to vector<2x64xf32>
    %280 = vector.extract_strided_slice %278 {offsets = [0, 0], sizes = [2, 64], strides = [1, 1]} : vector<2x96xf32> to vector<2x64xf32>
    %281 = arith.addf %279, %280 : vector<2x64xf32>
    %282 = arith.negf %281 : vector<2x64xf32>
    %283 = math.exp %282 : vector<2x64xf32>
    %cst_64 = arith.constant 1.000000e+00 : f32
    %284 = vector.broadcast %cst_64 : f32 to vector<2x64xf32>
    %285 = arith.addf %284, %283 : vector<2x64xf32>
    %286 = arith.divf %284, %285 : vector<2x64xf32>
    %287 = vector.extract_strided_slice %286 {offsets = [0, 0], sizes = [2, 32], strides = [1, 1]} : vector<2x64xf32> to vector<2x32xf32>
    %288 = vector.extract_strided_slice %286 {offsets = [0, 32], sizes = [2, 32], strides = [1, 1]} : vector<2x64xf32> to vector<2x32xf32>
    %289 = vector.extract_strided_slice %243 {offsets = [0, 64], sizes = [2, 32], strides = [1, 1]} : vector<2x96xf32> to vector<2x32xf32>
    %290 = vector.extract_strided_slice %278 {offsets = [0, 64], sizes = [2, 32], strides = [1, 1]} : vector<2x96xf32> to vector<2x32xf32>
    %291 = arith.mulf %287, %290 : vector<2x32xf32>
    %292 = arith.addf %289, %291 : vector<2x32xf32>
    %293 = math.tanh %292 : vector<2x32xf32>
    %cst_65 = arith.constant 1.000000e+00 : f32
    %294 = vector.broadcast %cst_65 : f32 to vector<2x32xf32>
    %295 = arith.subf %294, %288 : vector<2x32xf32>
    %296 = arith.mulf %295, %293 : vector<2x32xf32>
    %297 = arith.mulf %288, %274 : vector<2x32xf32>
    %298 = arith.addf %296, %297 : vector<2x32xf32>
    %299 = arith.truncf %298 : vector<2x32xf32> to vector<2x32xbf16>
    %cst_66 = arith.constant dense<0.000000e+00> : vector<2x96xf32>
    %300 = tpu.matmul %299, %240, %cst_66 {dimension_numbers = #tpu.dot_dimension_numbers<[1], [0], [0], [1], [0, 0, 1, 1], [], []>} : vector<2x32xbf16>, vector<32x96xbf16>, vector<2x96xf32> -> vector<2x96xf32>
    %301 = vector.broadcast %241 : vector<1x96xf32> to vector<2x96xf32>
    %302 = arith.addf %300, %301 : vector<2x96xf32>
    %303 = vector.extract_strided_slice %244 {offsets = [0, 0], sizes = [2, 64], strides = [1, 1]} : vector<2x96xf32> to vector<2x64xf32>
    %304 = vector.extract_strided_slice %302 {offsets = [0, 0], sizes = [2, 64], strides = [1, 1]} : vector<2x96xf32> to vector<2x64xf32>
    %305 = arith.addf %303, %304 : vector<2x64xf32>
    %306 = arith.negf %305 : vector<2x64xf32>
    %307 = math.exp %306 : vector<2x64xf32>
    %cst_67 = arith.constant 1.000000e+00 : f32
    %308 = vector.broadcast %cst_67 : f32 to vector<2x64xf32>
    %309 = arith.addf %308, %307 : vector<2x64xf32>
    %310 = arith.divf %308, %309 : vector<2x64xf32>
    %311 = vector.extract_strided_slice %310 {offsets = [0, 0], sizes = [2, 32], strides = [1, 1]} : vector<2x64xf32> to vector<2x32xf32>
    %312 = vector.extract_strided_slice %310 {offsets = [0, 32], sizes = [2, 32], strides = [1, 1]} : vector<2x64xf32> to vector<2x32xf32>
    %313 = vector.extract_strided_slice %244 {offsets = [0, 64], sizes = [2, 32], strides = [1, 1]} : vector<2x96xf32> to vector<2x32xf32>
    %314 = vector.extract_strided_slice %302 {offsets = [0, 64], sizes = [2, 32], strides = [1, 1]} : vector<2x96xf32> to vector<2x32xf32>
    %315 = arith.mulf %311, %314 : vector<2x32xf32>
    %316 = arith.addf %313, %315 : vector<2x32xf32>
    %317 = math.tanh %316 : vector<2x32xf32>
    %cst_68 = arith.constant 1.000000e+00 : f32
    %318 = vector.broadcast %cst_68 : f32 to vector<2x32xf32>
    %319 = arith.subf %318, %312 : vector<2x32xf32>
    %320 = arith.mulf %319, %317 : vector<2x32xf32>
    %321 = arith.mulf %312, %298 : vector<2x32xf32>
    %322 = arith.addf %320, %321 : vector<2x32xf32>
    %323 = arith.truncf %322 : vector<2x32xf32> to vector<2x32xbf16>
    %cst_69 = arith.constant dense<0.000000e+00> : vector<2x96xf32>
    %324 = tpu.matmul %323, %240, %cst_69 {dimension_numbers = #tpu.dot_dimension_numbers<[1], [0], [0], [1], [0, 0, 1, 1], [], []>} : vector<2x32xbf16>, vector<32x96xbf16>, vector<2x96xf32> -> vector<2x96xf32>
    %325 = vector.broadcast %241 : vector<1x96xf32> to vector<2x96xf32>
    %326 = arith.addf %324, %325 : vector<2x96xf32>
    %327 = vector.extract_strided_slice %245 {offsets = [0, 0], sizes = [2, 64], strides = [1, 1]} : vector<2x96xf32> to vector<2x64xf32>
    %328 = vector.extract_strided_slice %326 {offsets = [0, 0], sizes = [2, 64], strides = [1, 1]} : vector<2x96xf32> to vector<2x64xf32>
    %329 = arith.addf %327, %328 : vector<2x64xf32>
    %330 = arith.negf %329 : vector<2x64xf32>
    %331 = math.exp %330 : vector<2x64xf32>
    %cst_70 = arith.constant 1.000000e+00 : f32
    %332 = vector.broadcast %cst_70 : f32 to vector<2x64xf32>
    %333 = arith.addf %332, %331 : vector<2x64xf32>
    %334 = arith.divf %332, %333 : vector<2x64xf32>
    %335 = vector.extract_strided_slice %334 {offsets = [0, 0], sizes = [2, 32], strides = [1, 1]} : vector<2x64xf32> to vector<2x32xf32>
    %336 = vector.extract_strided_slice %334 {offsets = [0, 32], sizes = [2, 32], strides = [1, 1]} : vector<2x64xf32> to vector<2x32xf32>
    %337 = vector.extract_strided_slice %245 {offsets = [0, 64], sizes = [2, 32], strides = [1, 1]} : vector<2x96xf32> to vector<2x32xf32>
    %338 = vector.extract_strided_slice %326 {offsets = [0, 64], sizes = [2, 32], strides = [1, 1]} : vector<2x96xf32> to vector<2x32xf32>
    %339 = arith.mulf %335, %338 : vector<2x32xf32>
    %340 = arith.addf %337, %339 : vector<2x32xf32>
    %341 = math.tanh %340 : vector<2x32xf32>
    %cst_71 = arith.constant 1.000000e+00 : f32
    %342 = vector.broadcast %cst_71 : f32 to vector<2x32xf32>
    %343 = arith.subf %342, %336 : vector<2x32xf32>
    %344 = arith.mulf %343, %341 : vector<2x32xf32>
    %345 = arith.mulf %336, %322 : vector<2x32xf32>
    %346 = arith.addf %344, %345 : vector<2x32xf32>
    %347 = arith.truncf %346 : vector<2x32xf32> to vector<2x32xbf16>
    %cst_72 = arith.constant dense<0.000000e+00> : vector<2x96xf32>
    %348 = tpu.matmul %347, %240, %cst_72 {dimension_numbers = #tpu.dot_dimension_numbers<[1], [0], [0], [1], [0, 0, 1, 1], [], []>} : vector<2x32xbf16>, vector<32x96xbf16>, vector<2x96xf32> -> vector<2x96xf32>
    %349 = vector.broadcast %241 : vector<1x96xf32> to vector<2x96xf32>
    %350 = arith.addf %348, %349 : vector<2x96xf32>
    %351 = vector.extract_strided_slice %246 {offsets = [0, 0], sizes = [2, 64], strides = [1, 1]} : vector<2x96xf32> to vector<2x64xf32>
    %352 = vector.extract_strided_slice %350 {offsets = [0, 0], sizes = [2, 64], strides = [1, 1]} : vector<2x96xf32> to vector<2x64xf32>
    %353 = arith.addf %351, %352 : vector<2x64xf32>
    %354 = arith.negf %353 : vector<2x64xf32>
    %355 = math.exp %354 : vector<2x64xf32>
    %cst_73 = arith.constant 1.000000e+00 : f32
    %356 = vector.broadcast %cst_73 : f32 to vector<2x64xf32>
    %357 = arith.addf %356, %355 : vector<2x64xf32>
    %358 = arith.divf %356, %357 : vector<2x64xf32>
    %359 = vector.extract_strided_slice %358 {offsets = [0, 0], sizes = [2, 32], strides = [1, 1]} : vector<2x64xf32> to vector<2x32xf32>
    %360 = vector.extract_strided_slice %358 {offsets = [0, 32], sizes = [2, 32], strides = [1, 1]} : vector<2x64xf32> to vector<2x32xf32>
    %361 = vector.extract_strided_slice %246 {offsets = [0, 64], sizes = [2, 32], strides = [1, 1]} : vector<2x96xf32> to vector<2x32xf32>
    %362 = vector.extract_strided_slice %350 {offsets = [0, 64], sizes = [2, 32], strides = [1, 1]} : vector<2x96xf32> to vector<2x32xf32>
    %363 = arith.mulf %359, %362 : vector<2x32xf32>
    %364 = arith.addf %361, %363 : vector<2x32xf32>
    %365 = math.tanh %364 : vector<2x32xf32>
    %cst_74 = arith.constant 1.000000e+00 : f32
    %366 = vector.broadcast %cst_74 : f32 to vector<2x32xf32>
    %367 = arith.subf %366, %360 : vector<2x32xf32>
    %368 = arith.mulf %367, %365 : vector<2x32xf32>
    %369 = arith.mulf %360, %346 : vector<2x32xf32>
    %370 = arith.addf %368, %369 : vector<2x32xf32>
    %371 = arith.truncf %370 : vector<2x32xf32> to vector<2x32xbf16>
    %cst_75 = arith.constant dense<0.000000e+00> : vector<2x96xf32>
    %372 = tpu.matmul %371, %240, %cst_75 {dimension_numbers = #tpu.dot_dimension_numbers<[1], [0], [0], [1], [0, 0, 1, 1], [], []>} : vector<2x32xbf16>, vector<32x96xbf16>, vector<2x96xf32> -> vector<2x96xf32>
    %373 = vector.broadcast %241 : vector<1x96xf32> to vector<2x96xf32>
    %374 = arith.addf %372, %373 : vector<2x96xf32>
    %375 = vector.extract_strided_slice %247 {offsets = [0, 0], sizes = [2, 64], strides = [1, 1]} : vector<2x96xf32> to vector<2x64xf32>
    %376 = vector.extract_strided_slice %374 {offsets = [0, 0], sizes = [2, 64], strides = [1, 1]} : vector<2x96xf32> to vector<2x64xf32>
    %377 = arith.addf %375, %376 : vector<2x64xf32>
    %378 = arith.negf %377 : vector<2x64xf32>
    %379 = math.exp %378 : vector<2x64xf32>
    %cst_76 = arith.constant 1.000000e+00 : f32
    %380 = vector.broadcast %cst_76 : f32 to vector<2x64xf32>
    %381 = arith.addf %380, %379 : vector<2x64xf32>
    %382 = arith.divf %380, %381 : vector<2x64xf32>
    %383 = vector.extract_strided_slice %382 {offsets = [0, 0], sizes = [2, 32], strides = [1, 1]} : vector<2x64xf32> to vector<2x32xf32>
    %384 = vector.extract_strided_slice %382 {offsets = [0, 32], sizes = [2, 32], strides = [1, 1]} : vector<2x64xf32> to vector<2x32xf32>
    %385 = vector.extract_strided_slice %247 {offsets = [0, 64], sizes = [2, 32], strides = [1, 1]} : vector<2x96xf32> to vector<2x32xf32>
    %386 = vector.extract_strided_slice %374 {offsets = [0, 64], sizes = [2, 32], strides = [1, 1]} : vector<2x96xf32> to vector<2x32xf32>
    %387 = arith.mulf %383, %386 : vector<2x32xf32>
    %388 = arith.addf %385, %387 : vector<2x32xf32>
    %389 = math.tanh %388 : vector<2x32xf32>
    %cst_77 = arith.constant 1.000000e+00 : f32
    %390 = vector.broadcast %cst_77 : f32 to vector<2x32xf32>
    %391 = arith.subf %390, %384 : vector<2x32xf32>
    %392 = arith.mulf %391, %389 : vector<2x32xf32>
    %393 = arith.mulf %384, %370 : vector<2x32xf32>
    %394 = arith.addf %392, %393 : vector<2x32xf32>
    %395 = arith.truncf %394 : vector<2x32xf32> to vector<2x32xbf16>
    %cst_78 = arith.constant dense<0.000000e+00> : vector<2x96xf32>
    %396 = tpu.matmul %395, %240, %cst_78 {dimension_numbers = #tpu.dot_dimension_numbers<[1], [0], [0], [1], [0, 0, 1, 1], [], []>} : vector<2x32xbf16>, vector<32x96xbf16>, vector<2x96xf32> -> vector<2x96xf32>
    %397 = vector.broadcast %241 : vector<1x96xf32> to vector<2x96xf32>
    %398 = arith.addf %396, %397 : vector<2x96xf32>
    %399 = vector.extract_strided_slice %248 {offsets = [0, 0], sizes = [2, 64], strides = [1, 1]} : vector<2x96xf32> to vector<2x64xf32>
    %400 = vector.extract_strided_slice %398 {offsets = [0, 0], sizes = [2, 64], strides = [1, 1]} : vector<2x96xf32> to vector<2x64xf32>
    %401 = arith.addf %399, %400 : vector<2x64xf32>
    %402 = arith.negf %401 : vector<2x64xf32>
    %403 = math.exp %402 : vector<2x64xf32>
    %cst_79 = arith.constant 1.000000e+00 : f32
    %404 = vector.broadcast %cst_79 : f32 to vector<2x64xf32>
    %405 = arith.addf %404, %403 : vector<2x64xf32>
    %406 = arith.divf %404, %405 : vector<2x64xf32>
    %407 = vector.extract_strided_slice %406 {offsets = [0, 0], sizes = [2, 32], strides = [1, 1]} : vector<2x64xf32> to vector<2x32xf32>
    %408 = vector.extract_strided_slice %406 {offsets = [0, 32], sizes = [2, 32], strides = [1, 1]} : vector<2x64xf32> to vector<2x32xf32>
    %409 = vector.extract_strided_slice %248 {offsets = [0, 64], sizes = [2, 32], strides = [1, 1]} : vector<2x96xf32> to vector<2x32xf32>
    %410 = vector.extract_strided_slice %398 {offsets = [0, 64], sizes = [2, 32], strides = [1, 1]} : vector<2x96xf32> to vector<2x32xf32>
    %411 = arith.mulf %407, %410 : vector<2x32xf32>
    %412 = arith.addf %409, %411 : vector<2x32xf32>
    %413 = math.tanh %412 : vector<2x32xf32>
    %cst_80 = arith.constant 1.000000e+00 : f32
    %414 = vector.broadcast %cst_80 : f32 to vector<2x32xf32>
    %415 = arith.subf %414, %408 : vector<2x32xf32>
    %416 = arith.mulf %415, %413 : vector<2x32xf32>
    %417 = arith.mulf %408, %394 : vector<2x32xf32>
    %418 = arith.addf %416, %417 : vector<2x32xf32>
    %419 = arith.truncf %418 : vector<2x32xf32> to vector<2x32xbf16>
    %cst_81 = arith.constant dense<0.000000e+00> : vector<2x96xf32>
    %420 = tpu.matmul %419, %240, %cst_81 {dimension_numbers = #tpu.dot_dimension_numbers<[1], [0], [0], [1], [0, 0, 1, 1], [], []>} : vector<2x32xbf16>, vector<32x96xbf16>, vector<2x96xf32> -> vector<2x96xf32>
    %421 = vector.broadcast %241 : vector<1x96xf32> to vector<2x96xf32>
    %422 = arith.addf %420, %421 : vector<2x96xf32>
    %423 = vector.extract_strided_slice %249 {offsets = [0, 0], sizes = [2, 64], strides = [1, 1]} : vector<2x96xf32> to vector<2x64xf32>
    %424 = vector.extract_strided_slice %422 {offsets = [0, 0], sizes = [2, 64], strides = [1, 1]} : vector<2x96xf32> to vector<2x64xf32>
    %425 = arith.addf %423, %424 : vector<2x64xf32>
    %426 = arith.negf %425 : vector<2x64xf32>
    %427 = math.exp %426 : vector<2x64xf32>
    %cst_82 = arith.constant 1.000000e+00 : f32
    %428 = vector.broadcast %cst_82 : f32 to vector<2x64xf32>
    %429 = arith.addf %428, %427 : vector<2x64xf32>
    %430 = arith.divf %428, %429 : vector<2x64xf32>
    %431 = vector.extract_strided_slice %430 {offsets = [0, 0], sizes = [2, 32], strides = [1, 1]} : vector<2x64xf32> to vector<2x32xf32>
    %432 = vector.extract_strided_slice %430 {offsets = [0, 32], sizes = [2, 32], strides = [1, 1]} : vector<2x64xf32> to vector<2x32xf32>
    %433 = vector.extract_strided_slice %249 {offsets = [0, 64], sizes = [2, 32], strides = [1, 1]} : vector<2x96xf32> to vector<2x32xf32>
    %434 = vector.extract_strided_slice %422 {offsets = [0, 64], sizes = [2, 32], strides = [1, 1]} : vector<2x96xf32> to vector<2x32xf32>
    %435 = arith.mulf %431, %434 : vector<2x32xf32>
    %436 = arith.addf %433, %435 : vector<2x32xf32>
    %437 = math.tanh %436 : vector<2x32xf32>
    %cst_83 = arith.constant 1.000000e+00 : f32
    %438 = vector.broadcast %cst_83 : f32 to vector<2x32xf32>
    %439 = arith.subf %438, %432 : vector<2x32xf32>
    %440 = arith.mulf %439, %437 : vector<2x32xf32>
    %441 = arith.mulf %432, %418 : vector<2x32xf32>
    %442 = arith.addf %440, %441 : vector<2x32xf32>
    %c144 = arith.constant 144 : index
    %c0_84 = arith.constant 0 : index
    %443 = vector.load %arg1[%c144, %c0_84] : memref<192x128xbf16, #tpu.memory_space<vmem>>, vector<32x16xbf16>
    %444 = arith.truncf %442 : vector<2x32xf32> to vector<2x32xbf16>
    %cst_85 = arith.constant dense<0.000000e+00> : vector<2x16xf32>
    %445 = tpu.matmul %444, %443, %cst_85 {dimension_numbers = #tpu.dot_dimension_numbers<[1], [0], [0], [1], [0, 0, 1, 1], [], []>} : vector<2x32xbf16>, vector<32x16xbf16>, vector<2x16xf32> -> vector<2x16xf32>
    %c5_86 = arith.constant 5 : index
    %c0_87 = arith.constant 0 : index
    %446 = vector.load %arg2[%c5_86, %c0_87] : memref<8x128xf32, #tpu.memory_space<vmem>>, vector<1x16xf32>
    %447 = vector.broadcast %446 : vector<1x16xf32> to vector<2x16xf32>
    %448 = arith.addf %445, %447 : vector<2x16xf32>
    %cst_88 = arith.constant 5.000000e-01 : f32
    %449 = vector.broadcast %cst_88 : f32 to vector<2x16xf32>
    %450 = arith.mulf %449, %448 : vector<2x16xf32>
    %cst_89 = arith.constant 0.707106769 : f32
    %451 = vector.broadcast %cst_89 : f32 to vector<2x16xf32>
    %452 = arith.mulf %448, %451 : vector<2x16xf32>
    %453 = math.erf %452 : vector<2x16xf32>
    %cst_90 = arith.constant 1.000000e+00 : f32
    %454 = vector.broadcast %cst_90 : f32 to vector<2x16xf32>
    %455 = arith.addf %454, %453 : vector<2x16xf32>
    %456 = arith.mulf %450, %455 : vector<2x16xf32>
    %c176 = arith.constant 176 : index
    %c0_91 = arith.constant 0 : index
    %457 = vector.load %arg1[%c176, %c0_91] : memref<192x128xbf16, #tpu.memory_space<vmem>>, vector<16x1xbf16>
    %458 = arith.truncf %456 : vector<2x16xf32> to vector<2x16xbf16>
    %cst_92 = arith.constant dense<0.000000e+00> : vector<2x1xf32>
    %459 = tpu.matmul %458, %457, %cst_92 {dimension_numbers = #tpu.dot_dimension_numbers<[1], [0], [0], [1], [0, 0, 1, 1], [], []>} : vector<2x16xbf16>, vector<16x1xbf16>, vector<2x1xf32> -> vector<2x1xf32>
    %c6_93 = arith.constant 6 : index
    %c0_94 = arith.constant 0 : index
    %460 = vector.load %arg2[%c6_93, %c0_94] : memref<8x128xf32, #tpu.memory_space<vmem>>, vector<1x1xf32>
    %461 = vector.broadcast %460 : vector<1x1xf32> to vector<2x1xf32>
    %462 = arith.addf %459, %461 : vector<2x1xf32>
    %463 = arith.negf %462 : vector<2x1xf32>
    %464 = math.exp %463 : vector<2x1xf32>
    %cst_95 = arith.constant 1.000000e+00 : f32
    %465 = vector.broadcast %cst_95 : f32 to vector<2x1xf32>
    %466 = arith.addf %465, %464 : vector<2x1xf32>
    %467 = arith.divf %465, %466 : vector<2x1xf32>
    %c0_96 = arith.constant 0 : index
    %c0_97 = arith.constant 0 : index
    %468 = vector.load %arg3[%c0_96, %c0_97] : memref<2x1xf32, #tpu.memory_space<vmem>>, vector<2x1xf32>
    tpu.vector_store %arg3[%c0_96, %c0_97], %467 {strides = array<i32>} : memref<2x1xf32, #tpu.memory_space<vmem>>, vector<2x1xf32>,
    return
  }
}

</mosaic_0001>

<bundles_post_ra>
// kernel: tpu_custom_call.1
= control target key start
LH: loop header
LB: loop body
LE: loop exit
PB: predicated region body
PF: predicated region fallthrough
CT: control target
= control target key end

     0   :  { %8 = vsyncpa [#allocation3], 0  ;;  %s2605_s0 = inlined_call_operand.hbm [shape: f32[2,8,16], index: 0, kind: input, shape index: {}]   ;;  %s2606_s1 = inlined_call_operand.hbm [shape: bf16[192,128], index: 1, kind: input, shape index: {}]   ;;  %s2607_s2 = inlined_call_operand.hbm [shape: f32[8,128], index: 2, kind: input, shape index: {}]   ;;  %s2608_s3 = inlined_call_operand.vmem [shape: f32[2,1], index: 3, kind: output, shape index: {}]  }
   0x1   :  { %9 = vsyncpa [#allocation5], 0  ;;  %s2231_s12 = smov [#allocation4]   ;;  %s2161_s16 = scalar_lea.hbm %s2606_s1, 1536 }
   0x2   :  { %s27_s13 = sshll.u32 %s2231_s12, 4  ;;  %p2162_p0 = scmp.ne.s32.totalorder %s2606_s1, %s2161_s16  ;;  %s28_s13 = int_to_ptr.vmem [resolvable:$true] %s27_s13 }
   0x3   :  { %p2165_p1 = scmp.lt.u32.totalorder %s2161_s16, %s2606_s1 }
   0x5   :  { %p2167_p2 = pnand %p2165_p1, %p2162_p0 }
   0x7   :  { %2170 = shalt.err (!%p2167_p2)
}
   0x8   :  { %s2171_s21 = scalar_lea.vmem %s28_s13, 1536  ;;  %p2176_p4 = scmp.lt.s32.totalorder %s28_s13, %s28_s13 }
   0x9   :  { %p2172_p3 = scmp.ne.s32.totalorder %s28_s13, %s2171_s21  ;;  %p2177_p5 = scmp.lt.s32.totalorder %s2171_s21, %s2171_s21 }
   0xb   :  { %p2178_p6 = por %p2177_p5, %p2176_p4 }
   0xd   :  { %p2179_p7 = pnand %p2178_p6, %p2172_p3 }
   0xf   :  { %2182 = shalt.err (!%p2179_p7)
}
  0x10   :  { %s2232_s22 = smov 64   ;;  %s2233_s23 = smov 4  }
  0x11   :  { %33 = dma.hbm_to_vmem [thread:$0]  %s2606_s1, 1536, %s28_s13, [#allocation5], %s2232_s22, %s2232_s22, %s2233_s23  }
  0x12   :  { %s2234_s26 = smov [#allocation2]   ;;  %s2183_s30 = scalar_lea.hbm %s2605_s0, 256 }
  0x13   :  { %s15_s27 = sshll.u32 %s2234_s26, 4  ;;  %p2184_p8 = scmp.ne.s32.totalorder %s2605_s0, %s2183_s30  ;;  %s16_s27 = int_to_ptr.vmem [resolvable:$true] %s15_s27 }
  0x14   :  { %p2187_p9 = scmp.lt.u32.totalorder %s2183_s30, %s2605_s0 }
  0x16   :  { %p2189_p10 = pnand %p2187_p9, %p2184_p8 }
  0x18   :  { %2192 = shalt.err (!%p2189_p10)
}
  0x19   :  { %s2193_s8 = scalar_lea.vmem %s16_s27, 256  ;;  %p2198_p12 = scmp.lt.s32.totalorder %s16_s27, %s16_s27 }
  0x1a   :  { %p2194_p11 = scmp.ne.s32.totalorder %s16_s27, %s2193_s8  ;;  %p2199_p13 = scmp.lt.s32.totalorder %s2193_s8, %s2193_s8 }
  0x1c   :  { %p2200_p0 = por %p2199_p13, %p2198_p12 }
  0x1e   :  { %p2201_p1 = pnand %p2200_p0, %p2194_p11 }
  0x20   :  { %2204 = shalt.err (!%p2201_p1)
}
  0x21   :  { %s2235_s1 = smov 128   ;;  %s2236_s9 = smov 8  }
  0x22   :  { %21 = dma.hbm_to_vmem [thread:$0]  %s2605_s0, 256, %s16_s27, [#allocation3], %s2235_s1, %s2235_s1, %s2236_s9  }
  0x23   :  { %s2237_s12 = smov [#allocation6]   ;;  %s2205_s16 = scalar_lea.hbm %s2607_s2, 128 }
  0x24   :  { %s40_s13 = sshll.u32 %s2237_s12, 4  ;;  %p2206_p2 = scmp.ne.s32.totalorder %s2607_s2, %s2205_s16  ;;  %s41_s13 = int_to_ptr.vmem [resolvable:$true] %s40_s13 }
  0x25   :  { %p2209_p3 = scmp.lt.u32.totalorder %s2205_s16, %s2607_s2 }
  0x27   :  { %p2211_p4 = pnand %p2209_p3, %p2206_p2 }
  0x29   :  { %2214 = shalt.err (!%p2211_p4)
}
  0x2a   :  { %s2215_s21 = scalar_lea.vmem %s41_s13, 128  ;;  %p2220_p6 = scmp.lt.s32.totalorder %s41_s13, %s41_s13 }
  0x2b   :  { %p2216_p5 = scmp.ne.s32.totalorder %s41_s13, %s2215_s21  ;;  %p2221_p7 = scmp.lt.s32.totalorder %s2215_s21, %s2215_s21 }
  0x2d   :  { %p2222_p8 = por %p2221_p7, %p2220_p6 }
  0x2f   :  { %p2223_p9 = pnand %p2222_p8, %p2216_p5 }
  0x31   :  { %2226 = shalt.err (!%p2223_p9)
}
  0x32   :  { %43 = dma.hbm_to_vmem [thread:$0]  %s2607_s2, 128, %s41_s13, [#allocation5]  }
  0x33   :  { %2227 = dma.done.wait [#allocation3], 256  }
  0x34   :  { %2228 = vsyncadd [#allocation3], 4294967040 }
  0x35   :  { %2229 = dma.done.wait [#allocation5], 1664  }
  0x36   :  { %2230 = vsyncadd [#allocation5], 4294965632  ;;  %v2238_v0 = vmov 0.0   ;;  %vm2239_vm0 = vmmov 0   ;;  %vm73_vm1 = vcmask 1041409   ;;  %v2043_v1 = vld [vmem:[#allocation4] sm:$0xff]  }
  0x37   :  { %1868 = vmatprep.subr.bf16.mxu0 %v2238_v0  ;;  %1870 = vmatprep.mubr.msk.bf16.mxu0 %vm2239_vm0, %v2238_v0  ;;  %vm80_vm2 = vcmask 1043459   ;;  %v55_v2 = vld [vmem:[#allocation2 + $0x8] sm:$0x1]  ;;  %vm87_vm3 = vcmask 1045509   ;;  %vm94_vm4 = vcmask 1047559   ;;  %vm120_vm5 = vcmask 1041408  }
  0x38   :  { %1874 = vmatprep.subr.bf16.mxu1 %v2238_v0  ;;  %1878 = vmatprep.mubr.msk.bf16.mxu1 %vm2239_vm0, %v2238_v0  ;;  %vm122_vm6 = vcmask 1043456   ;;  %v56_v3 = vld [vmem:[#allocation2 + $0x1] sm:$0x1]  ;;  %v57_v4 = vld [vmem:[#allocation2 + $0x9] sm:$0x1]  ;;  %vm124_vm7 = vcmask 1045504  }
  0x39   :  { %1869 = vmatpush3.bf16.msra.mxu0 %v2043_v1  ;;  %v58_v5 = vld [vmem:[#allocation2 + $0x2] sm:$0x1]  ;;  %v54_v6 = vld [vmem:[#allocation2] sm:$0x1]  ;;  %v59_v7 = vld [vmem:[#allocation2 + $0xa] sm:$0x1] }
  0x3a   :  { %v60_v8 = vld [vmem:[#allocation2 + $0x3] sm:$0x1]  ;;  %v61_v9 = vld [vmem:[#allocation2 + $0xb] sm:$0x1]  ;;  %1882 = vmatprep.subr.bf16.mxu0 %v2238_v0  ;;  %v62_v10 = vld [vmem:[#allocation2 + $0x4] sm:$0x1] }
  0x3b   :  { %v63_v11 = vld [vmem:[#allocation2 + $0xc] sm:$0x1]  ;;  %v64_v12 = vld [vmem:[#allocation2 + $0x5] sm:$0x1]  ;;  %v65_v13 = vld [vmem:[#allocation2 + $0xd] sm:$0x1] }
  0x3c   :  { %v66_v14 = vld [vmem:[#allocation2 + $0x6] sm:$0x1]  ;;  %v67_v15 = vld [vmem:[#allocation2 + $0xe] sm:$0x1]  ;;  %v68_v16 = vld [vmem:[#allocation2 + $0x7] sm:$0x1] }
  0x3d   :  { %v69_v17 = vld [vmem:[#allocation2 + $0xf] sm:$0x1]  ;;  %v72_v18 = vrot.slane %v55_v2, 7  ;;  %v78_v19 = vrot.slane %v56_v3, 6  ;;  %v79_v20 = vrot.slane %v57_v4, 5  ;;  %v85_v21 = vrot.slane %v58_v5, 4 }
  0x3e   :  { %vm143_vm8 = vcmask 130048   ;;  %v86_v22 = vrot.slane %v59_v7, 3  ;;  %v92_v23 = vrot.slane %v60_v8, 2  ;;  %v93_v24 = vrot.slane %v61_v9, 1  ;;  %v2318_v43 = vld [vmem:[#allocation4 + $0x18] sm:$0xff]   ;;  %v2325_v48 = vld [vmem:[#allocation4 + $0x20] sm:$0xff]  }
  0x3f   :  { %v99_v25 = vrot.slane %v63_v11, 7  ;;  %v74_v26 = vsel %vm73_vm1, %v72_v18, %v54_v6  ;;  %v81_v27 = vsel %vm80_vm2, %v79_v20, %v78_v19  ;;  %v104_v28 = vrot.slane %v64_v12, 6  ;;  %v2046_v50 = vld [vmem:[#allocation4 + $0x8] sm:$0xff]   ;;  %v2047_v51 = vld [vmem:[#allocation4 + $0x10] sm:$0xff]   ;;  %v1752_v52 = vld [vmem:[#allocation6] ss:$0 sm:$0xff] }
  0x40   :  { %v105_v29 = vrot.slane %v65_v13, 5  ;;  %v88_v30 = vsel %vm87_vm3, %v86_v22, %v85_v21  ;;  %v95_v31 = vsel %vm94_vm4, %v93_v24, %v92_v23  ;;  %v110_v33 = vrot.slane %v66_v14, 4  ;;  %1875 = vmatpush3.bf16.msra.mxu1 %v2046_v50  ;;  %v2341_v59 = vld [vmem:[#allocation6 + $0x2] ss:$0 sm:$0xff]  ;;  %v1755_v5 = vld [vmem:[#allocation6 + $0x1] ss:$0 sm:$0xff] }
  0x41   :  { %v100_v32 = vsel %vm73_vm1, %v99_v25, %v62_v10  ;;  %v111_v35 = vrot.slane %v67_v15, 3  ;;  %v116_v36 = vrot.slane %v68_v16, 2  ;;  %v117_v37 = vrot.slane %v69_v17, 1  ;;  %1876 = vmatprep.subr.bf16.mxu1 %v2238_v0  ;;  %s2241_s2 = smov 96  }
  0x42   :  { %v106_v34 = vsel %vm80_vm2, %v105_v29, %v104_v28  ;;  %v121_v38 = vsel %vm120_vm5, %v74_v26, %v81_v27  ;;  %v2240_v49 = vmov 0   ;;  %vm212_vm9 = vcmask 261120  }
  0x43   :  { %v126_v39 = vsel %vm120_vm5, %v100_v32, %v106_v34  ;;  %v112_v40 = vsel %vm87_vm3, %v111_v35, %v110_v33  ;;  %v118_v41 = vsel %vm94_vm4, %v117_v37, %v116_v36  ;;  %v123_v42 = vsel %vm122_vm6, %v121_v38, %v88_v30 }
  0x44   :  { %v125_v44 = vsel %vm124_vm7, %v123_v42, %v95_v31  ;;  %v127_v45 = vsel %vm122_vm6, %v126_v39, %v112_v40  ;;  %1877 = vmatpush3.bf16.msra.mxu1 %v2047_v51  ;;  %vm1744_vm10 = vcmask 1024  }
  0x45   :  { %v128_v46 = vsel %vm124_vm7, %v127_v45, %v118_v41  ;;  %1890 = vmatprep.subr.bf16.mxu1 %v2238_v0 }
  0x46   :  { %v131_v47 = vpack.c.bf16 %v128_v46, %v125_v44 }
  0x48   :  { %1871 = vmatmul.mubr.msk.bf16.vlgmr.msra.gmra.mrb[0].mxu0 %vm143_vm8, %v131_v47 }
  0x49   :  { %1883 = vmatpush3.bf16.msra.mxu0 %v2318_v43  ;;  %1886 = vmatprep.mubr.msk.bf16.mxu0 %vm2239_vm0, %v2238_v0 }
  0x4a   :  { %1884 = vmatprep.subr.bf16.mxu0 %v2238_v0 }
  0x4d   :  { %1885 = vmatpush3.bf16.msra.mxu0 %v2325_v48 }
  0x4e   :  { %1898 = vmatprep.subr.bf16.mxu0 %v2238_v0 }
  0x50   :  { %1887 = vmatmul.mubr.bf16.vlgmr.msra.gmra.mrb[4].mxu0 %v2240_v49 }
  0x51   :  { %1899 = vmatpush3.bf16.msra.mxu0 %v2318_v43  ;;  %1902 = vmatprep.mubr.msk.bf16.mxu0 %vm2239_vm0, %v2238_v0 }
  0x52   :  { %1900 = vmatprep.subr.bf16.mxu0 %v2238_v0 }
  0x55   :  { %1901 = vmatpush3.bf16.msra.mxu0 %v2325_v48 }
  0x56   :  { %1914 = vmatprep.subr.bf16.mxu0 %v2238_v0 }
 0x11b   :  { %v181_v53 = vpop.f32.mrb[0].mxu0 }
 0x11c   :  { %v182_v54 = vadd.f32 %v1752_v52, %v181_v53  ;;  %v1872_v55 = vpop.f32.mrb[1].mxu0 }
 0x11d   :  { %v184_v56 = vpop.f32.mrb[2].mxu0 }
 0x11e   :  { %v185_v57 = vadd.f32 %v1752_v52, %v184_v56  ;;  %v1873_v58 = vpop.f32.mrb[3].mxu0  ;;  %2055 = vtanh.f32 %v182_v54 }
 0x120   :  { %2057 = vtanh.f32 %v185_v57 }
 0x123   :  { %v315_v60 = vpop.f32.mrb[4].mxu0 }
 0x124   :  { %v316_v61 = vadd.f32 %v2341_v59, %v315_v60  ;;  %v1888_v62 = vpop.f32.mrb[5].mxu0 }
 0x125   :  { %v318_v63 = vpop.f32.mrb[6].mxu0 }
 0x126   :  { %v1889_v1 = vpop.f32.mrb[7].mxu0  ;;  %329 = vrot.lane.b32.xlu0 %v316_v61, %s2232_s22 }
 0x128   :  { %v2056_v2 = vpop.eup %2055 }
 0x12a   :  { %v2058_v3 = vpop.eup %2057 }
 0x12b   :  { %v194_v4 = vpack.c.bf16 %v2058_v3, %v2056_v2 }
 0x12d   :  { %1879 = vmatmul.mubr.msk.bf16.vlgmr.msra.gmra.mrb[0].mxu1 %vm212_vm9, %v194_v4 }
 0x12e   :  { %1891 = vmatpush3.bf16.msra.mxu1 %v2318_v43  ;;  %1894 = vmatprep.mubr.msk.bf16.mxu1 %vm2239_vm0, %v2238_v0 }
 0x12f   :  { %1892 = vmatprep.subr.bf16.mxu1 %v2238_v0 }
 0x132   :  { %1893 = vmatpush3.bf16.msra.mxu1 %v2325_v48 }
 0x133   :  { %1906 = vmatprep.subr.bf16.mxu1 %v2238_v0 }
 0x198   :  { %v330_v16 = vpop.permute.xlu0 %329 }
 0x200   :  { %v250_v6 = vpop.f32.mrb[0].mxu1 }
 0x201   :  { %v2352_v7 = vadd.f32 %v1755_v5, %v250_v6  ;;  %v1880_v8 = vpop.f32.mrb[1].mxu1 }
 0x202   :  { %v253_v9 = vpop.f32.mrb[2].mxu1 }
 0x203   :  { %v2354_v10 = vadd.f32 %v1755_v5, %v253_v9  ;;  %v1881_v11 = vpop.f32.mrb[3].mxu1  ;;  %v321_v12 = vadd.f32 %v316_v61, %v2352_v7 }
 0x205   :  { %v1762_v13 = vmul.f32 -1.442695, %v321_v12 }
 0x207   :  { %2059 = vpow2.f32 %v1762_v13 }
 0x211   :  { %v2060_v14 = vpop.eup %2059 }
 0x212   :  { %v325_v15 = vadd.f32 1.0, %v2060_v14 }
 0x214   :  { %2061 = vrcp.f32 %v325_v15 }
 0x21e   :  { %v2062_v17 = vpop.eup %2061 }
 0x21f   :  { %v332_v18 = vmul.f32 %v2062_v17, %v330_v16  ;;  %v339_v22 = vsub.f32 1.0, %v2062_v17  ;;  %v345_v24 = vmul.f32 0.0, %v2062_v17 }
 0x221   :  { %334 = vrot.lane.b32.xlu0 %v332_v18, %s2232_s22 }
 0x293   :  { %v335_v19 = vpop.permute.xlu0 %334 }
 0x294   :  { %v337_v20 = vadd.f32 %v335_v19, %v2352_v7 }
 0x296   :  { %2063 = vtanh.f32 %v337_v20 }
 0x2a0   :  { %v2064_v21 = vpop.eup %2063 }
 0x2a1   :  { %341 = vrot.lane.b32.xlu1 %v2064_v21, %s2241_s2 }
 0x313   :  { %v342_v23 = vpop.permute.xlu1 %341 }
 0x314   :  { %v344_v25 = vmul.f32 %v342_v23, %v339_v22 }
 0x316   :  { %v2360_v26 = vadd.f32 %v345_v24, %v344_v25 }
 0x318   :  { %v347_v27 = vpack.c.bf16 %v2360_v26, %v2360_v26  ;;  %v421_v47 = vrot.slane %v2360_v26, 6 }
 0x31a   :  { %349 = vrot.lane.b32.xlu1 %v347_v27, %s2241_s2 }
 0x38c   :  { %v350_v28 = vpop.permute.xlu1 %349 }
 0x38d   :  { %1895 = vmatmul.mubr.msk.bf16.vlgmr.msra.gmra.mrb[4].mxu1 %vm212_vm9, %v350_v28 }
 0x38e   :  { %1907 = vmatpush3.bf16.msra.mxu1 %v2318_v43  ;;  %1910 = vmatprep.mubr.msk.bf16.mxu1 %vm2239_vm0, %v2238_v0 }
 0x38f   :  { %1908 = vmatprep.subr.bf16.mxu1 %v2238_v0 }
 0x392   :  { %1909 = vmatpush3.bf16.msra.mxu1 %v2325_v48 }
 0x393   :  { %1922 = vmatprep.subr.bf16.mxu1 %v2238_v0 }
 0x460   :  { %v388_v29 = vpop.f32.mrb[4].mxu1 }
 0x461   :  { %v389_v30 = vadd.f32 %v2341_v59, %v388_v29  ;;  %v1896_v31 = vpop.f32.mrb[5].mxu1 }
 0x462   :  { %v391_v32 = vpop.f32.mrb[6].mxu1 }
 0x463   :  { %v395_v33 = vrot.slane %v389_v30, 6  ;;  %v1897_v34 = vpop.f32.mrb[7].mxu1 }
 0x465   :  { %404 = vrot.lane.b32.xlu0 %v395_v33, %s2232_s22  ;;  %v397_v35 = vadd.f32 %v395_v33, %v2352_v7 }
 0x467   :  { %v1764_v36 = vmul.f32 -1.442695, %v397_v35 }
 0x469   :  { %2065 = vpow2.f32 %v1764_v36 }
 0x473   :  { %v2066_v37 = vpop.eup %2065 }
 0x474   :  { %v401_v38 = vadd.f32 1.0, %v2066_v37 }
 0x476   :  { %2067 = vrcp.f32 %v401_v38 }
 0x480   :  { %v2068_v39 = vpop.eup %2067 }
 0x481   :  { %v414_v46 = vsub.f32 1.0, %v2068_v39  ;;  %v423_v51 = vmul.f32 %v2068_v39, %v421_v47 }
 0x4d7   :  { %v405_v40 = vpop.permute.xlu0 %404 }
 0x4d8   :  { %v407_v41 = vmul.f32 %v2068_v39, %v405_v40 }
 0x4da   :  { %409 = vrot.lane.b32.xlu1 %v407_v41, %s2232_s22 }
 0x54c   :  { %v410_v42 = vpop.permute.xlu1 %409 }
 0x54d   :  { %v412_v44 = vadd.f32 %v410_v42, %v2352_v7 }
 0x54f   :  { %2069 = vtanh.f32 %v412_v44 }
 0x559   :  { %v2070_v45 = vpop.eup %2069 }
 0x55a   :  { %416 = vrot.lane.b32.xlu0 %v2070_v45, %s2241_s2 }
 0x5cc   :  { %v417_v50 = vpop.permute.xlu0 %416 }
 0x5cd   :  { %v419_v52 = vmul.f32 %v417_v50, %v414_v46 }
 0x5cf   :  { %v424_v53 = vadd.f32 %v423_v51, %v419_v52 }
 0x5d1   :  { %v425_v54 = vpack.c.bf16 %v424_v53, %v424_v53  ;;  %v500_v14 = vrot.slane %v424_v53, 6  ;;  %v896_v19 = vsel %vm120_vm5, %v2360_v26, %v424_v53 }
 0x5d3   :  { %v427_v55 = vrot.slane %v425_v54, 1 }
 0x5d5   :  { %428 = vrot.lane.b32.xlu1 %v427_v55, %s2241_s2 }
 0x647   :  { %v429_v56 = vpop.permute.xlu1 %428 }
 0x648   :  { %1903 = vmatmul.mubr.msk.bf16.vlgmr.msra.gmra.mrb[8].mxu0 %vm212_vm9, %v429_v56 }
 0x649   :  { %1915 = vmatpush3.bf16.msra.mxu0 %v2318_v43  ;;  %1918 = vmatprep.mubr.msk.bf16.mxu0 %vm2239_vm0, %v2238_v0 }
 0x64a   :  { %1916 = vmatprep.subr.bf16.mxu0 %v2238_v0 }
 0x64d   :  { %1917 = vmatpush3.bf16.msra.mxu0 %v2325_v48 }
 0x64e   :  { %1930 = vmatprep.subr.bf16.mxu0 %v2238_v0 }
 0x71b   :  { %v467_v57 = vpop.f32.mrb[8].mxu0 }
 0x71c   :  { %v468_v58 = vadd.f32 %v2341_v59, %v467_v57  ;;  %v1904_v60 = vpop.f32.mrb[9].mxu0 }
 0x71d   :  { %v470_v61 = vpop.f32.mrb[10].mxu0 }
 0x71e   :  { %v474_v62 = vrot.slane %v468_v58, 4  ;;  %v1905_v63 = vpop.f32.mrb[11].mxu0 }
 0x720   :  { %483 = vrot.lane.b32.xlu0 %v474_v62, %s2232_s22  ;;  %v476_v1 = vadd.f32 %v474_v62, %v2352_v7 }
 0x722   :  { %v1766_v2 = vmul.f32 -1.442695, %v476_v1 }
 0x724   :  { %2071 = vpow2.f32 %v1766_v2 }
 0x72e   :  { %v2072_v3 = vpop.eup %2071 }
 0x72f   :  { %v480_v4 = vadd.f32 1.0, %v2072_v3 }
 0x731   :  { %2073 = vrcp.f32 %v480_v4 }
 0x73b   :  { %v2074_v5 = vpop.eup %2073 }
 0x73c   :  { %v493_v13 = vsub.f32 1.0, %v2074_v5  ;;  %v502_v16 = vmul.f32 %v2074_v5, %v500_v14 }
 0x792   :  { %v484_v6 = vpop.permute.xlu0 %483 }
 0x793   :  { %v486_v8 = vmul.f32 %v2074_v5, %v484_v6 }
 0x795   :  { %488 = vrot.lane.b32.xlu1 %v486_v8, %s2232_s22 }
 0x807   :  { %v489_v9 = vpop.permute.xlu1 %488 }
 0x808   :  { %v491_v11 = vadd.f32 %v489_v9, %v2352_v7 }
 0x80a   :  { %2075 = vtanh.f32 %v491_v11 }
 0x814   :  { %v2076_v12 = vpop.eup %2075 }
 0x815   :  { %495 = vrot.lane.b32.xlu0 %v2076_v12, %s2241_s2 }
 0x887   :  { %v496_v15 = vpop.permute.xlu0 %495 }
 0x888   :  { %v498_v17 = vmul.f32 %v496_v15, %v493_v13 }
 0x88a   :  { %v503_v18 = vadd.f32 %v502_v16, %v498_v17 }
 0x88c   :  { %v897_v20 = vsel %vm122_vm6, %v896_v19, %v503_v18  ;;  %v504_v21 = vpack.c.bf16 %v503_v18, %v503_v18  ;;  %v579_v41 = vrot.slane %v503_v18, 6 }
 0x88e   :  { %v506_v22 = vrot.slane %v504_v21, 2 }
 0x890   :  { %507 = vrot.lane.b32.xlu1 %v506_v22, %s2241_s2 }
 0x902   :  { %v508_v23 = vpop.permute.xlu1 %507 }
 0x903   :  { %1911 = vmatmul.mubr.msk.bf16.vlgmr.msra.gmra.mrb[8].mxu1 %vm212_vm9, %v508_v23 }
 0x904   :  { %1923 = vmatpush3.bf16.msra.mxu1 %v2318_v43  ;;  %1926 = vmatprep.mubr.msk.bf16.mxu1 %vm2239_vm0, %v2238_v0 }
 0x905   :  { %1924 = vmatprep.subr.bf16.mxu1 %v2238_v0 }
 0x908   :  { %1925 = vmatpush3.bf16.msra.mxu1 %v2325_v48 }
 0x909   :  { %1938 = vmatprep.subr.bf16.mxu1 %v2238_v0 }
 0x9d6   :  { %v546_v24 = vpop.f32.mrb[8].mxu1 }
 0x9d7   :  { %v547_v25 = vadd.f32 %v2341_v59, %v546_v24  ;;  %v1912_v26 = vpop.f32.mrb[9].mxu1 }
 0x9d8   :  { %v549_v27 = vpop.f32.mrb[10].mxu1 }
 0x9d9   :  { %v553_v28 = vrot.slane %v547_v25, 2  ;;  %v1913_v29 = vpop.f32.mrb[11].mxu1 }
 0x9db   :  { %562 = vrot.lane.b32.xlu0 %v553_v28, %s2232_s22  ;;  %v555_v30 = vadd.f32 %v553_v28, %v2352_v7 }
 0x9dd   :  { %v1768_v31 = vmul.f32 -1.442695, %v555_v30 }
 0x9df   :  { %2077 = vpow2.f32 %v1768_v31 }
 0x9e9   :  { %v2078_v32 = vpop.eup %2077 }
 0x9ea   :  { %v559_v33 = vadd.f32 1.0, %v2078_v32 }
 0x9ec   :  { %2079 = vrcp.f32 %v559_v33 }
 0x9f6   :  { %v2080_v34 = vpop.eup %2079 }
 0x9f7   :  { %v572_v40 = vsub.f32 1.0, %v2080_v34  ;;  %v581_v44 = vmul.f32 %v2080_v34, %v579_v41 }
 0xa4d   :  { %v563_v35 = vpop.permute.xlu0 %562 }
 0xa4e   :  { %v565_v36 = vmul.f32 %v2080_v34, %v563_v35 }
 0xa50   :  { %567 = vrot.lane.b32.xlu1 %v565_v36, %s2232_s22 }
 0xac2   :  { %v568_v37 = vpop.permute.xlu1 %567 }
 0xac3   :  { %v570_v38 = vadd.f32 %v568_v37, %v2352_v7 }
 0xac5   :  { %2081 = vtanh.f32 %v570_v38 }
 0xacf   :  { %v2082_v39 = vpop.eup %2081 }
 0xad0   :  { %574 = vrot.lane.b32.xlu0 %v2082_v39, %s2241_s2 }
 0xb42   :  { %v575_v42 = vpop.permute.xlu0 %574 }
 0xb43   :  { %v577_v45 = vmul.f32 %v575_v42, %v572_v40 }
 0xb45   :  { %v582_v46 = vadd.f32 %v581_v44, %v577_v45 }
 0xb47   :  { %v583_v47 = vpack.c.bf16 %v582_v46, %v582_v46  ;;  %v2411_v50 = vsel %vm124_vm7, %v897_v20, %v582_v46  ;;  %v656_v6 = vrot.slane %v582_v46, 6 }
 0xb49   :  { %v585_v51 = vrot.slane %v583_v47, 3 }
 0xb4b   :  { %586 = vrot.lane.b32.xlu1 %v585_v51, %s2241_s2 }
 0xbbd   :  { %v587_v52 = vpop.permute.xlu1 %586 }
 0xbbe   :  { %1919 = vmatmul.mubr.msk.bf16.vlgmr.msra.gmra.mrb[12].mxu0 %vm212_vm9, %v587_v52 }
 0xbbf   :  { %1931 = vmatpush3.bf16.msra.mxu0 %v2318_v43  ;;  %1934 = vmatprep.mubr.msk.bf16.mxu0 %vm2239_vm0, %v2238_v0 }
 0xbc0   :  { %1932 = vmatprep.subr.bf16.mxu0 %v2238_v0 }
 0xbc3   :  { %1933 = vmatpush3.bf16.msra.mxu0 %v2325_v48 }
 0xbc4   :  { %1946 = vmatprep.subr.bf16.mxu0 %v2238_v0 }
 0xc91   :  { %v625_v7 = vpop.f32.mrb[12].mxu0 }
 0xc92   :  { %v626_v53 = vadd.f32 %v2341_v59, %v625_v7  ;;  %v1920_v54 = vpop.f32.mrb[13].mxu0 }
 0xc93   :  { %v628_v55 = vpop.f32.mrb[14].mxu0 }
 0xc94   :  { %639 = vrot.lane.b32.xlu0 %v626_v53, %s2232_s22  ;;  %v1921_v56 = vpop.f32.mrb[15].mxu0  ;;  %v631_v57 = vadd.f32 %v626_v53, %v2354_v10 }
 0xc96   :  { %v1770_v58 = vmul.f32 -1.442695, %v631_v57 }
 0xc98   :  { %2083 = vpow2.f32 %v1770_v58 }
 0xca2   :  { %v2084_v60 = vpop.eup %2083 }
 0xca3   :  { %v635_v61 = vadd.f32 1.0, %v2084_v60 }
 0xca5   :  { %2085 = vrcp.f32 %v635_v61 }
 0xcaf   :  { %v2086_v62 = vpop.eup %2085 }
 0xcb0   :  { %v649_v5 = vsub.f32 1.0, %v2086_v62  ;;  %v658_v9 = vmul.f32 %v2086_v62, %v656_v6 }
 0xd06   :  { %v640_v63 = vpop.permute.xlu0 %639 }
 0xd07   :  { %v642_v1 = vmul.f32 %v2086_v62, %v640_v63 }
 0xd09   :  { %644 = vrot.lane.b32.xlu1 %v642_v1, %s2232_s22 }
 0xd7b   :  { %v645_v2 = vpop.permute.xlu1 %644 }
 0xd7c   :  { %v647_v3 = vadd.f32 %v645_v2, %v2354_v10 }
 0xd7e   :  { %2087 = vtanh.f32 %v647_v3 }
 0xd88   :  { %v2088_v4 = vpop.eup %2087 }
 0xd89   :  { %651 = vrot.lane.b32.xlu0 %v2088_v4, %s2241_s2 }
 0xdfb   :  { %v652_v8 = vpop.permute.xlu0 %651 }
 0xdfc   :  { %v654_v11 = vmul.f32 %v652_v8, %v649_v5 }
 0xdfe   :  { %v2427_v12 = vadd.f32 %v658_v9, %v654_v11 }
 0xe00   :  { %v660_v13 = vpack.c.bf16 %v2427_v12, %v2427_v12  ;;  %v734_v30 = vrot.slane %v2427_v12, 6 }
 0xe02   :  { %662 = vrot.lane.b32.xlu1 %v660_v13, %s2241_s2 }
 0xe74   :  { %v663_v14 = vpop.permute.xlu1 %662 }
 0xe75   :  { %1927 = vmatmul.mubr.msk.bf16.vlgmr.msra.gmra.mrb[12].mxu1 %vm212_vm9, %v663_v14 }
 0xe76   :  { %1939 = vmatpush3.bf16.msra.mxu1 %v2318_v43  ;;  %1942 = vmatprep.mubr.msk.bf16.mxu1 %vm2239_vm0, %v2238_v0 }
 0xe77   :  { %1940 = vmatprep.subr.bf16.mxu1 %v2238_v0 }
 0xe7a   :  { %1941 = vmatpush3.bf16.msra.mxu1 %v2325_v48 }
 0xe7b   :  { %1954 = vmatprep.subr.bf16.mxu1 %v2238_v0 }
 0xf48   :  { %v701_v15 = vpop.f32.mrb[12].mxu1 }
 0xf49   :  { %v702_v16 = vadd.f32 %v2341_v59, %v701_v15  ;;  %v1928_v17 = vpop.f32.mrb[13].mxu1 }
 0xf4a   :  { %v704_v18 = vpop.f32.mrb[14].mxu1 }
 0xf4b   :  { %v708_v19 = vrot.slane %v702_v16, 6  ;;  %v1929_v20 = vpop.f32.mrb[15].mxu1 }
 0xf4d   :  { %717 = vrot.lane.b32.xlu0 %v708_v19, %s2232_s22  ;;  %v710_v43 = vadd.f32 %v708_v19, %v2354_v10 }
 0xf4f   :  { %v1772_v21 = vmul.f32 -1.442695, %v710_v43 }
 0xf51   :  { %2089 = vpow2.f32 %v1772_v21  ;;  %v2468_v21 = vld [vmem:[#allocation4 + $0x38] sm:$0xff]  }
 0xf5b   :  { %v2090_v22 = vpop.eup %2089 }
 0xf5c   :  { %v714_v23 = vadd.f32 1.0, %v2090_v22  ;;  %v2050_v22 = vld [vmem:[#allocation4 + $0x28] sm:$0xff]  }
 0xf5e   :  { %2091 = vrcp.f32 %v714_v23  ;;  %v2471_v23 = vld [vmem:[#allocation4 + $0x40] sm:$0xff]  }
 0xf68   :  { %v2092_v24 = vpop.eup %2091 }
 0xf69   :  { %v727_v29 = vsub.f32 1.0, %v2092_v24  ;;  %v736_v32 = vmul.f32 %v2092_v24, %v734_v30 }
 0xfbf   :  { %v718_v48 = vpop.permute.xlu0 %717 }
 0xfc0   :  { %v720_v25 = vmul.f32 %v2092_v24, %v718_v48  ;;  %v2051_v24 = vld [vmem:[#allocation4 + $0x30] sm:$0xff]  }
 0xfc2   :  { %722 = vrot.lane.b32.xlu1 %v720_v25, %s2232_s22 }
0x1034   :  { %v723_v26 = vpop.permute.xlu1 %722 }
0x1035   :  { %v725_v27 = vadd.f32 %v723_v26, %v2354_v10 }
0x1037   :  { %2093 = vtanh.f32 %v725_v27 }
0x1041   :  { %v2094_v28 = vpop.eup %2093 }
0x1042   :  { %729 = vrot.lane.b32.xlu0 %v2094_v28, %s2241_s2 }
0x10b4   :  { %v730_v31 = vpop.permute.xlu0 %729 }
0x10b5   :  { %v732_v33 = vmul.f32 %v730_v31, %v727_v29  ;;  %v2489_v31 = vld [vmem:[#allocation6 + $0x4] ss:$0 sm:$0xff] }
0x10b7   :  { %v737_v34 = vadd.f32 %v736_v32, %v732_v33 }
0x10b9   :  { %v738_v35 = vpack.c.bf16 %v737_v34, %v737_v34  ;;  %v813_v58 = vrot.slane %v737_v34, 6  ;;  %v899_v1 = vsel %vm120_vm5, %v2427_v12, %v737_v34 }
0x10bb   :  { %v740_v36 = vrot.slane %v738_v35, 1 }
0x10bd   :  { %741 = vrot.lane.b32.xlu1 %v740_v36, %s2241_s2 }
0x112f   :  { %v742_v37 = vpop.permute.xlu1 %741 }
0x1130   :  { %1935 = vmatmul.mubr.msk.bf16.vlgmr.msra.gmra.mrb[16].mxu0 %vm212_vm9, %v742_v37 }
0x1131   :  { %1950 = vmatprep.mubr.msk.bf16.mxu0 %vm2239_vm0, %v2238_v0  ;;  %1947 = vmatpush3.bf16.msra.mxu0 %v2050_v22 }
0x1132   :  { %1948 = vmatprep.subr.bf16.mxu0 %v2238_v0 }
0x1135   :  { %1949 = vmatpush3.bf16.msra.mxu0 %v2051_v24 }
0x1136   :  { %1962 = vmatprep.subr.bf16.mxu0 %v2238_v0 }
0x1203   :  { %v780_v38 = vpop.f32.mrb[16].mxu0 }
0x1204   :  { %v781_v39 = vadd.f32 %v2341_v59, %v780_v38  ;;  %v1936_v40 = vpop.f32.mrb[17].mxu0 }
0x1205   :  { %v783_v41 = vpop.f32.mrb[18].mxu0 }
0x1206   :  { %v787_v42 = vrot.slane %v781_v39, 4  ;;  %v1937_v44 = vpop.f32.mrb[19].mxu0 }
0x1208   :  { %796 = vrot.lane.b32.xlu0 %v787_v42, %s2232_s22  ;;  %v789_v45 = vadd.f32 %v787_v42, %v2354_v10 }
0x120a   :  { %v1774_v46 = vmul.f32 -1.442695, %v789_v45 }
0x120c   :  { %2095 = vpow2.f32 %v1774_v46 }
0x1216   :  { %v2096_v47 = vpop.eup %2095 }
0x1217   :  { %v793_v51 = vadd.f32 1.0, %v2096_v47 }
0x1219   :  { %2097 = vrcp.f32 %v793_v51 }
0x1223   :  { %v2098_v52 = vpop.eup %2097 }
0x1224   :  { %v806_v57 = vsub.f32 1.0, %v2098_v52  ;;  %v815_v61 = vmul.f32 %v2098_v52, %v813_v58 }
0x127a   :  { %v797_v7 = vpop.permute.xlu0 %796 }
0x127b   :  { %v799_v53 = vmul.f32 %v2098_v52, %v797_v7 }
0x127d   :  { %801 = vrot.lane.b32.xlu1 %v799_v53, %s2232_s22 }
0x12ef   :  { %v802_v54 = vpop.permute.xlu1 %801 }
0x12f0   :  { %v804_v55 = vadd.f32 %v802_v54, %v2354_v10 }
0x12f2   :  { %2099 = vtanh.f32 %v804_v55 }
0x12fc   :  { %v2100_v56 = vpop.eup %2099 }
0x12fd   :  { %808 = vrot.lane.b32.xlu0 %v2100_v56, %s2241_s2 }
0x136f   :  { %v809_v60 = vpop.permute.xlu0 %808 }
0x1370   :  { %v811_v62 = vmul.f32 %v809_v60, %v806_v57 }
0x1372   :  { %v816_v63 = vadd.f32 %v815_v61, %v811_v62 }
0x1374   :  { %v900_v2 = vsel %vm122_vm6, %v899_v1, %v816_v63  ;;  %v817_v3 = vpack.c.bf16 %v816_v63, %v816_v63  ;;  %v892_v25 = vrot.slane %v816_v63, 6 }
0x1376   :  { %v819_v4 = vrot.slane %v817_v3, 2 }
0x1378   :  { %820 = vrot.lane.b32.xlu1 %v819_v4, %s2241_s2 }
0x13ea   :  { %v821_v5 = vpop.permute.xlu1 %820 }
0x13eb   :  { %1943 = vmatmul.mubr.msk.bf16.vlgmr.msra.gmra.mrb[16].mxu1 %vm212_vm9, %v821_v5 }
0x13ec   :  { %1958 = vmatprep.mubr.msk.bf16.mxu1 %vm2239_vm0, %v2238_v0  ;;  %1955 = vmatpush3.bf16.msra.mxu1 %v2468_v21 }
0x13ed   :  { %1956 = vmatprep.subr.bf16.mxu1 %v2238_v0 }
0x13f0   :  { %1957 = vmatpush3.bf16.msra.mxu1 %v2471_v23 }
0x13f1   :  { %1970 = vmatprep.subr.bf16.mxu1 %v2238_v0 }
0x13f3   :  { %1959 = vmatmul.mubr.bf16.vlgmr.msra.gmra.mrb[20].mxu1 %v2240_v49 }
0x13f4   :  { %1971 = vmatpush3.bf16.msra.mxu1 %v2468_v21  ;;  %1974 = vmatprep.mubr.msk.bf16.mxu1 %vm2239_vm0, %v2238_v0 }
0x13f5   :  { %1972 = vmatprep.subr.bf16.mxu1 %v2238_v0 }
0x13f8   :  { %1973 = vmatpush3.bf16.msra.mxu1 %v2471_v23 }
0x13f9   :  { %1986 = vmatprep.subr.bf16.mxu1 %v2238_v0 }
0x14be   :  { %v859_v6 = vpop.f32.mrb[16].mxu1 }
0x14bf   :  { %v860_v8 = vadd.f32 %v2341_v59, %v859_v6  ;;  %v1944_v9 = vpop.f32.mrb[17].mxu1 }
0x14c0   :  { %v862_v11 = vpop.f32.mrb[18].mxu1 }
0x14c1   :  { %v866_v13 = vrot.slane %v860_v8, 2  ;;  %v1945_v14 = vpop.f32.mrb[19].mxu1 }
0x14c3   :  { %875 = vrot.lane.b32.xlu0 %v866_v13, %s2232_s22  ;;  %v868_v12 = vadd.f32 %v866_v13, %v2354_v10 }
0x14c5   :  { %v1776_v15 = vmul.f32 -1.442695, %v868_v12 }
0x14c6   :  { %v1026_v32 = vpop.f32.mrb[20].mxu1 }
0x14c7   :  { %2101 = vpow2.f32 %v1776_v15  ;;  %v1027_v33 = vadd.f32 %v2489_v31, %v1026_v32  ;;  %v1960_v34 = vpop.f32.mrb[21].mxu1 }
0x14c8   :  { %v1029_v35 = vpop.f32.mrb[22].mxu1 }
0x14c9   :  { %v1961_v36 = vpop.f32.mrb[23].mxu1 }
0x14d1   :  { %v2102_v16 = vpop.eup %2101 }
0x14d2   :  { %v872_v17 = vadd.f32 1.0, %v2102_v16 }
0x14d4   :  { %2103 = vrcp.f32 %v872_v17 }
0x14de   :  { %v2104_v18 = vpop.eup %2103 }
0x14df   :  { %v894_v27 = vmul.f32 %v2104_v18, %v892_v25 }
0x1535   :  { %v876_v19 = vpop.permute.xlu0 %875 }
0x1536   :  { %v878_v20 = vmul.f32 %v2104_v18, %v876_v19 }
0x1538   :  { %880 = vrot.lane.b32.xlu1 %v878_v20, %s2232_s22 }
0x15aa   :  { %v881_v43 = vpop.permute.xlu1 %880 }
0x15ab   :  { %v883_v59 = vadd.f32 %v881_v43, %v2354_v10  ;;  %v885_v10 = vsub.f32 1.0, %v2104_v18 }
0x15ad   :  { %2105 = vtanh.f32 %v883_v59 }
0x15b7   :  { %v2106_v48 = vpop.eup %2105 }
0x15b8   :  { %887 = vrot.lane.b32.xlu0 %v2106_v48, %s2241_s2 }
0x15bc   :  { %1040 = vrot.lane.b32.xlu0 %v1027_v33, %s2232_s22 }
0x162a   :  { %v888_v26 = vpop.permute.xlu0 %887 }
0x162b   :  { %v890_v28 = vmul.f32 %v888_v26, %v885_v10 }
0x162d   :  { %v895_v29 = vadd.f32 %v894_v27, %v890_v28 }
0x162e   :  { %v1041_v52 = vpop.permute.xlu0 %1040 }
0x162f   :  { %v901_v30 = vsel %vm124_vm7, %v900_v2, %v895_v29 }
0x1630   :  { %v906_v49 = vpack.c.bf16 %v901_v30, %v2411_v50  ;;  %v1777_v50 = vld [vmem:[#allocation6 + $0x3] ss:$0 sm:$0xff] }
0x1632   :  { %913 = vrot.lane.b32.xlu1 %v906_v49, %s2241_s2 }
0x16a4   :  { %v914_v37 = vpop.permute.xlu1 %913 }
0x16a5   :  { %1951 = vmatmul.mubr.msk.bf16.vlgmr.msra.gmra.mrb[20].mxu0 %vm212_vm9, %v914_v37 }
0x16a6   :  { %1963 = vmatpush3.bf16.msra.mxu0 %v2468_v21  ;;  %1966 = vmatprep.mubr.msk.bf16.mxu0 %vm2239_vm0, %v2238_v0 }
0x16a7   :  { %1964 = vmatprep.subr.bf16.mxu0 %v2238_v0 }
0x16aa   :  { %1965 = vmatpush3.bf16.msra.mxu0 %v2471_v23 }
0x16ab   :  { %1978 = vmatprep.subr.bf16.mxu0 %v2238_v0 }
0x1778   :  { %v964_v38 = vpop.f32.mrb[20].mxu0 }
0x1779   :  { %v2500_v39 = vadd.f32 %v1777_v50, %v964_v38  ;;  %v1952_v40 = vpop.f32.mrb[21].mxu0 }
0x177a   :  { %v967_v41 = vpop.f32.mrb[22].mxu0 }
0x177b   :  { %v2502_v42 = vadd.f32 %v1777_v50, %v967_v41  ;;  %v1953_v44 = vpop.f32.mrb[23].mxu0  ;;  %v1032_v45 = vadd.f32 %v1027_v33, %v2500_v39 }
0x177d   :  { %v1784_v46 = vmul.f32 -1.442695, %v1032_v45 }
0x177f   :  { %2107 = vpow2.f32 %v1784_v46 }
0x1789   :  { %v2108_v47 = vpop.eup %2107 }
0x178a   :  { %v1036_v51 = vadd.f32 1.0, %v2108_v47 }
0x178c   :  { %2109 = vrcp.f32 %v1036_v51 }
0x1796   :  { %v2110_v7 = vpop.eup %2109 }
0x1797   :  { %v1043_v53 = vmul.f32 %v2110_v7, %v1041_v52  ;;  %v1050_v57 = vsub.f32 1.0, %v2110_v7  ;;  %v1056_v60 = vmul.f32 0.0, %v2110_v7 }
0x1799   :  { %1045 = vrot.lane.b32.xlu1 %v1043_v53, %s2232_s22 }
0x180b   :  { %v1046_v54 = vpop.permute.xlu1 %1045 }
0x180c   :  { %v1048_v55 = vadd.f32 %v1046_v54, %v2500_v39 }
0x180e   :  { %2111 = vtanh.f32 %v1048_v55 }
0x1818   :  { %v2112_v56 = vpop.eup %2111 }
0x1819   :  { %1052 = vrot.lane.b32.xlu0 %v2112_v56, %s2241_s2 }
0x188b   :  { %v1053_v58 = vpop.permute.xlu0 %1052 }
0x188c   :  { %v1055_v61 = vmul.f32 %v1053_v58, %v1050_v57 }
0x188e   :  { %v1057_v62 = vadd.f32 %v1056_v60, %v1055_v61 }
0x1890   :  { %v1058_v63 = vpack.c.bf16 %v1057_v62, %v1057_v62  ;;  %v1132_v20 = vrot.slane %v1057_v62, 6 }
0x1892   :  { %1060 = vrot.lane.b32.xlu1 %v1058_v63, %s2241_s2 }
0x1904   :  { %v1061_v1 = vpop.permute.xlu1 %1060 }
0x1905   :  { %1967 = vmatmul.mubr.msk.bf16.vlgmr.msra.gmra.mrb[24].mxu0 %vm212_vm9, %v1061_v1 }
0x1906   :  { %1979 = vmatpush3.bf16.msra.mxu0 %v2468_v21  ;;  %1982 = vmatprep.mubr.msk.bf16.mxu0 %vm2239_vm0, %v2238_v0 }
0x1907   :  { %1980 = vmatprep.subr.bf16.mxu0 %v2238_v0 }
0x190a   :  { %1981 = vmatpush3.bf16.msra.mxu0 %v2471_v23 }
0x190b   :  { %1994 = vmatprep.subr.bf16.mxu0 %v2238_v0 }
0x19d8   :  { %v1099_v2 = vpop.f32.mrb[24].mxu0 }
0x19d9   :  { %v1100_v3 = vadd.f32 %v2489_v31, %v1099_v2  ;;  %v1968_v4 = vpop.f32.mrb[25].mxu0 }
0x19da   :  { %v1102_v5 = vpop.f32.mrb[26].mxu0 }
0x19db   :  { %v1106_v6 = vrot.slane %v1100_v3, 6  ;;  %v1969_v8 = vpop.f32.mrb[27].mxu0 }
0x19dd   :  { %1115 = vrot.lane.b32.xlu0 %v1106_v6, %s2232_s22  ;;  %v1108_v9 = vadd.f32 %v1106_v6, %v2500_v39 }
0x19df   :  { %v1786_v11 = vmul.f32 -1.442695, %v1108_v9 }
0x19e1   :  { %2113 = vpow2.f32 %v1786_v11 }
0x19eb   :  { %v2114_v13 = vpop.eup %2113 }
0x19ec   :  { %v1112_v14 = vadd.f32 1.0, %v2114_v13 }
0x19ee   :  { %2115 = vrcp.f32 %v1112_v14 }
0x19f8   :  { %v2116_v12 = vpop.eup %2115 }
0x19f9   :  { %v1125_v43 = vsub.f32 1.0, %v2116_v12  ;;  %v1134_v22 = vmul.f32 %v2116_v12, %v1132_v20 }
0x1a4f   :  { %v1116_v15 = vpop.permute.xlu0 %1115 }
0x1a50   :  { %v1118_v16 = vmul.f32 %v2116_v12, %v1116_v15 }
0x1a52   :  { %1120 = vrot.lane.b32.xlu1 %v1118_v16, %s2232_s22 }
0x1ac4   :  { %v1121_v17 = vpop.permute.xlu1 %1120 }
0x1ac5   :  { %v1123_v18 = vadd.f32 %v1121_v17, %v2500_v39 }
0x1ac7   :  { %2117 = vtanh.f32 %v1123_v18 }
0x1ad1   :  { %v2118_v19 = vpop.eup %2117 }
0x1ad2   :  { %1127 = vrot.lane.b32.xlu0 %v2118_v19, %s2241_s2 }
0x1b44   :  { %v1128_v59 = vpop.permute.xlu0 %1127 }
0x1b45   :  { %v1130_v24 = vmul.f32 %v1128_v59, %v1125_v43 }
0x1b47   :  { %v1135_v48 = vadd.f32 %v1134_v22, %v1130_v24 }
0x1b49   :  { %v1136_v10 = vpack.c.bf16 %v1135_v48, %v1135_v48  ;;  %v1211_v45 = vrot.slane %v1135_v48, 6 }
0x1b4b   :  { %v1138_v25 = vrot.slane %v1136_v10, 1 }
0x1b4d   :  { %1139 = vrot.lane.b32.xlu1 %v1138_v25, %s2241_s2 }
0x1bbf   :  { %v1140_v26 = vpop.permute.xlu1 %1139 }
0x1bc0   :  { %1975 = vmatmul.mubr.msk.bf16.vlgmr.msra.gmra.mrb[24].mxu1 %vm212_vm9, %v1140_v26 }
0x1bc1   :  { %1987 = vmatpush3.bf16.msra.mxu1 %v2468_v21  ;;  %1990 = vmatprep.mubr.msk.bf16.mxu1 %vm2239_vm0, %v2238_v0 }
0x1bc2   :  { %1988 = vmatprep.subr.bf16.mxu1 %v2238_v0 }
0x1bc5   :  { %1989 = vmatpush3.bf16.msra.mxu1 %v2471_v23 }
0x1bc6   :  { %2002 = vmatprep.subr.bf16.mxu1 %v2238_v0 }
0x1c93   :  { %v1178_v27 = vpop.f32.mrb[24].mxu1 }
0x1c94   :  { %v1179_v28 = vadd.f32 %v2489_v31, %v1178_v27  ;;  %v1976_v29 = vpop.f32.mrb[25].mxu1 }
0x1c95   :  { %v1181_v30 = vpop.f32.mrb[26].mxu1 }
0x1c96   :  { %v1185_v49 = vrot.slane %v1179_v28, 4  ;;  %v1977_v32 = vpop.f32.mrb[27].mxu1 }
0x1c98   :  { %1194 = vrot.lane.b32.xlu0 %v1185_v49, %s2232_s22  ;;  %v1187_v33 = vadd.f32 %v1185_v49, %v2500_v39 }
0x1c9a   :  { %v1788_v34 = vmul.f32 -1.442695, %v1187_v33 }
0x1c9c   :  { %2119 = vpow2.f32 %v1788_v34 }
0x1ca6   :  { %v2120_v35 = vpop.eup %2119 }
0x1ca7   :  { %v1191_v36 = vadd.f32 1.0, %v2120_v35 }
0x1ca9   :  { %2121 = vrcp.f32 %v1191_v36 }
0x1cb3   :  { %v2122_v37 = vpop.eup %2121 }
0x1cb4   :  { %v1204_v46 = vsub.f32 1.0, %v2122_v37  ;;  %v1213_v51 = vmul.f32 %v2122_v37, %v1211_v45 }
0x1d0a   :  { %v1195_v50 = vpop.permute.xlu0 %1194 }
0x1d0b   :  { %v1197_v38 = vmul.f32 %v2122_v37, %v1195_v50 }
0x1d0d   :  { %1199 = vrot.lane.b32.xlu1 %v1197_v38, %s2232_s22 }
0x1d7f   :  { %v1200_v40 = vpop.permute.xlu1 %1199 }
0x1d80   :  { %v1202_v41 = vadd.f32 %v1200_v40, %v2500_v39 }
0x1d82   :  { %2123 = vtanh.f32 %v1202_v41 }
0x1d8c   :  { %v2124_v44 = vpop.eup %2123 }
0x1d8d   :  { %1206 = vrot.lane.b32.xlu0 %v2124_v44, %s2241_s2 }
0x1dff   :  { %v1207_v47 = vpop.permute.xlu0 %1206 }
0x1e00   :  { %v1209_v52 = vmul.f32 %v1207_v47, %v1204_v46 }
0x1e02   :  { %v1214_v7 = vadd.f32 %v1213_v51, %v1209_v52 }
0x1e04   :  { %v1215_v53 = vpack.c.bf16 %v1214_v7, %v1214_v7  ;;  %v1290_v13 = vrot.slane %v1214_v7, 6 }
0x1e06   :  { %v1217_v54 = vrot.slane %v1215_v53, 2 }
0x1e08   :  { %1218 = vrot.lane.b32.xlu1 %v1217_v54, %s2241_s2 }
0x1e7a   :  { %v1219_v55 = vpop.permute.xlu1 %1218 }
0x1e7b   :  { %1983 = vmatmul.mubr.msk.bf16.vlgmr.msra.gmra.mrb[28].mxu0 %vm212_vm9, %v1219_v55 }
0x1e7c   :  { %1995 = vmatpush3.bf16.msra.mxu0 %v2468_v21  ;;  %1998 = vmatprep.mubr.msk.bf16.mxu0 %vm2239_vm0, %v2238_v0 }
0x1e7d   :  { %1996 = vmatprep.subr.bf16.mxu0 %v2238_v0 }
0x1e80   :  { %1997 = vmatpush3.bf16.msra.mxu0 %v2471_v23 }
0x1e81   :  { %2010 = vmatprep.subr.bf16.mxu0 %v2238_v0 }
0x1f4e   :  { %v1257_v56 = vpop.f32.mrb[28].mxu0 }
0x1f4f   :  { %v1258_v57 = vadd.f32 %v2489_v31, %v1257_v56  ;;  %v1984_v58 = vpop.f32.mrb[29].mxu0 }
0x1f50   :  { %v1260_v60 = vpop.f32.mrb[30].mxu0 }
0x1f51   :  { %v1264_v61 = vrot.slane %v1258_v57, 2  ;;  %v1985_v62 = vpop.f32.mrb[31].mxu0 }
0x1f53   :  { %1273 = vrot.lane.b32.xlu0 %v1264_v61, %s2232_s22  ;;  %v1266_v63 = vadd.f32 %v1264_v61, %v2500_v39 }
0x1f55   :  { %v1790_v1 = vmul.f32 -1.442695, %v1266_v63 }
0x1f57   :  { %2125 = vpow2.f32 %v1790_v1 }
0x1f61   :  { %v2126_v2 = vpop.eup %2125 }
0x1f62   :  { %v1270_v3 = vadd.f32 1.0, %v2126_v2 }
0x1f64   :  { %2127 = vrcp.f32 %v1270_v3 }
0x1f6e   :  { %v2128_v4 = vpop.eup %2127 }
0x1f6f   :  { %v1283_v14 = vsub.f32 1.0, %v2128_v4  ;;  %v1292_v15 = vmul.f32 %v2128_v4, %v1290_v13 }
0x1fc5   :  { %v1274_v5 = vpop.permute.xlu0 %1273 }
0x1fc6   :  { %v1276_v6 = vmul.f32 %v2128_v4, %v1274_v5 }
0x1fc8   :  { %1278 = vrot.lane.b32.xlu1 %v1276_v6, %s2232_s22 }
0x203a   :  { %v1279_v8 = vpop.permute.xlu1 %1278 }
0x203b   :  { %v1281_v9 = vadd.f32 %v1279_v8, %v2500_v39 }
0x203d   :  { %2129 = vtanh.f32 %v1281_v9 }
0x2047   :  { %v2130_v11 = vpop.eup %2129 }
0x2048   :  { %1285 = vrot.lane.b32.xlu0 %v2130_v11, %s2241_s2 }
0x20ba   :  { %v1286_v12 = vpop.permute.xlu0 %1285 }
0x20bb   :  { %v1288_v16 = vmul.f32 %v1286_v12, %v1283_v14 }
0x20bd   :  { %v1293_v17 = vadd.f32 %v1292_v15, %v1288_v16 }
0x20bf   :  { %v1294_v18 = vpack.c.bf16 %v1293_v17, %v1293_v17  ;;  %v1367_v33 = vrot.slane %v1293_v17, 6 }
0x20c1   :  { %v1296_v19 = vrot.slane %v1294_v18, 3 }
0x20c3   :  { %1297 = vrot.lane.b32.xlu1 %v1296_v19, %s2241_s2 }
0x2135   :  { %v1298_v20 = vpop.permute.xlu1 %1297 }
0x2136   :  { %1991 = vmatmul.mubr.msk.bf16.vlgmr.msra.gmra.mrb[28].mxu1 %vm212_vm9, %v1298_v20 }
0x2137   :  { %2003 = vmatpush3.bf16.msra.mxu1 %v2468_v21  ;;  %2006 = vmatprep.mubr.msk.bf16.mxu1 %vm2239_vm0, %v2238_v0 }
0x2138   :  { %2004 = vmatprep.subr.bf16.mxu1 %v2238_v0 }
0x213b   :  { %2005 = vmatpush3.bf16.msra.mxu1 %v2471_v23 }
0x213c   :  { %2018 = vmatprep.subr.bf16.mxu1 %v2238_v0 }
0x2209   :  { %v1336_v39 = vpop.f32.mrb[28].mxu1 }
0x220a   :  { %v1337_v43 = vadd.f32 %v2489_v31, %v1336_v39  ;;  %v1992_v59 = vpop.f32.mrb[29].mxu1 }
0x220b   :  { %v1339_v22 = vpop.f32.mrb[30].mxu1 }
0x220c   :  { %1350 = vrot.lane.b32.xlu0 %v1337_v43, %s2232_s22  ;;  %v1993_v24 = vpop.f32.mrb[31].mxu1  ;;  %v1342_v48 = vadd.f32 %v1337_v43, %v2502_v42 }
0x220e   :  { %v1792_v10 = vmul.f32 -1.442695, %v1342_v48 }
0x2210   :  { %2131 = vpow2.f32 %v1792_v10 }
0x221a   :  { %v2132_v25 = vpop.eup %2131 }
0x221b   :  { %v1346_v26 = vadd.f32 1.0, %v2132_v25 }
0x221d   :  { %2133 = vrcp.f32 %v1346_v26 }
0x2227   :  { %v2134_v27 = vpop.eup %2133 }
0x2228   :  { %v1360_v34 = vsub.f32 1.0, %v2134_v27  ;;  %v1369_v36 = vmul.f32 %v2134_v27, %v1367_v33 }
0x227e   :  { %v1351_v28 = vpop.permute.xlu0 %1350 }
0x227f   :  { %v1353_v29 = vmul.f32 %v2134_v27, %v1351_v28 }
0x2281   :  { %1355 = vrot.lane.b32.xlu1 %v1353_v29, %s2232_s22 }
0x22f3   :  { %v1356_v30 = vpop.permute.xlu1 %1355 }
0x22f4   :  { %v1358_v49 = vadd.f32 %v1356_v30, %v2502_v42 }
0x22f6   :  { %2135 = vtanh.f32 %v1358_v49 }
0x2300   :  { %v2136_v32 = vpop.eup %2135 }
0x2301   :  { %1362 = vrot.lane.b32.xlu0 %v2136_v32, %s2241_s2 }
0x2373   :  { %v1363_v35 = vpop.permute.xlu0 %1362 }
0x2374   :  { %v1365_v37 = vmul.f32 %v1363_v35, %v1360_v34 }
0x2376   :  { %v1370_v50 = vadd.f32 %v1369_v36, %v1365_v37 }
0x2378   :  { %v1371_v38 = vpack.c.bf16 %v1370_v50, %v1370_v50  ;;  %v1445_v60 = vrot.slane %v1370_v50, 6 }
0x237a   :  { %1373 = vrot.lane.b32.xlu1 %v1371_v38, %s2241_s2 }
0x23ec   :  { %v1374_v40 = vpop.permute.xlu1 %1373 }
0x23ed   :  { %1999 = vmatmul.mubr.msk.bf16.vlgmr.msra.gmra.mrb[32].mxu0 %vm212_vm9, %v1374_v40 }
0x23ee   :  { %2011 = vmatpush3.bf16.msra.mxu0 %v2468_v21  ;;  %2014 = vmatprep.mubr.msk.bf16.mxu0 %vm2239_vm0, %v2238_v0 }
0x23ef   :  { %2012 = vmatprep.subr.bf16.mxu0 %v2238_v0 }
0x23f2   :  { %2013 = vmatpush3.bf16.msra.mxu0 %v2471_v23 }
0x23f3   :  { %2026 = vmatprep.subr.bf16.mxu0 %v2238_v0 }
0x24c0   :  { %v1412_v41 = vpop.f32.mrb[32].mxu0 }
0x24c1   :  { %v1413_v44 = vadd.f32 %v2489_v31, %v1412_v41  ;;  %v2000_v45 = vpop.f32.mrb[33].mxu0 }
0x24c2   :  { %v1415_v46 = vpop.f32.mrb[34].mxu0 }
0x24c3   :  { %v1419_v47 = vrot.slane %v1413_v44, 6  ;;  %v2001_v51 = vpop.f32.mrb[35].mxu0  ;;  %v2052_v46 = vld [vmem:[#allocation4 + $0x48] sm:$0xff]  }
0x24c5   :  { %1428 = vrot.lane.b32.xlu0 %v1419_v47, %s2232_s22  ;;  %v1421_v21 = vadd.f32 %v1419_v47, %v2502_v42  ;;  %v2053_v47 = vld [vmem:[#allocation4 + $0x50] sm:$0xff]  }
0x24c7   :  { %v1794_v52 = vmul.f32 -1.442695, %v1421_v21 }
0x24c9   :  { %2137 = vpow2.f32 %v1794_v52 }
0x24d3   :  { %v2138_v7 = vpop.eup %2137 }
0x24d4   :  { %v1425_v53 = vadd.f32 1.0, %v2138_v7 }
0x24d6   :  { %2139 = vrcp.f32 %v1425_v53 }
0x24e0   :  { %v2140_v54 = vpop.eup %2139 }
0x24e1   :  { %v1438_v61 = vsub.f32 1.0, %v2140_v54  ;;  %v1447_v63 = vmul.f32 %v2140_v54, %v1445_v60 }
0x2537   :  { %v1429_v23 = vpop.permute.xlu0 %1428 }
0x2538   :  { %v1431_v55 = vmul.f32 %v2140_v54, %v1429_v23 }
0x253a   :  { %1433 = vrot.lane.b32.xlu1 %v1431_v55, %s2232_s22 }
0x25ac   :  { %v1434_v56 = vpop.permute.xlu1 %1433 }
0x25ad   :  { %v1436_v57 = vadd.f32 %v1434_v56, %v2502_v42 }
0x25af   :  { %2141 = vtanh.f32 %v1436_v57  ;;  %v2054_v57 = vld [vmem:[#allocation4 + $0x58] sm:$0xff]  }
0x25b9   :  { %v2142_v58 = vpop.eup %2141 }
0x25ba   :  { %1440 = vrot.lane.b32.xlu0 %v2142_v58, %s2241_s2 }
0x262c   :  { %v1441_v62 = vpop.permute.xlu0 %1440 }
0x262d   :  { %v1443_v1 = vmul.f32 %v1441_v62, %v1438_v61 }
0x262f   :  { %v1448_v2 = vadd.f32 %v1447_v63, %v1443_v1 }
0x2631   :  { %v1449_v3 = vpack.c.bf16 %v1448_v2, %v1448_v2  ;;  %v1524_v22 = vrot.slane %v1448_v2, 6 }
0x2633   :  { %v1451_v4 = vrot.slane %v1449_v3, 1 }
0x2635   :  { %1452 = vrot.lane.b32.xlu1 %v1451_v4, %s2241_s2 }
0x26a7   :  { %v1453_v5 = vpop.permute.xlu1 %1452 }
0x26a8   :  { %2007 = vmatmul.mubr.msk.bf16.vlgmr.msra.gmra.mrb[32].mxu1 %vm212_vm9, %v1453_v5 }
0x26a9   :  { %2022 = vmatprep.mubr.msk.bf16.mxu1 %vm2239_vm0, %v2238_v0  ;;  %2019 = vmatpush3.bf16.msra.mxu1 %v2052_v46 }
0x26aa   :  { %2020 = vmatprep.subr.bf16.mxu1 %v2238_v0 }
0x26ad   :  { %2021 = vmatpush3.bf16.msra.mxu1 %v2053_v47 }
0x277b   :  { %v1491_v6 = vpop.f32.mrb[32].mxu1 }
0x277c   :  { %v1492_v8 = vadd.f32 %v2489_v31, %v1491_v6  ;;  %v2008_v9 = vpop.f32.mrb[33].mxu1 }
0x277d   :  { %v1494_v11 = vpop.f32.mrb[34].mxu1 }
0x277e   :  { %v1498_v13 = vrot.slane %v1492_v8, 4  ;;  %v2009_v14 = vpop.f32.mrb[35].mxu1  ;;  %v1803_v8 = vld [vmem:[#allocation6 + $0x6] ss:$0 sm:$0xff] }
0x2780   :  { %1507 = vrot.lane.b32.xlu0 %v1498_v13, %s2232_s22  ;;  %v1500_v12 = vadd.f32 %v1498_v13, %v2502_v42 }
0x2782   :  { %v1796_v15 = vmul.f32 -1.442695, %v1500_v12 }
0x2784   :  { %2143 = vpow2.f32 %v1796_v15 }
0x278e   :  { %v2144_v16 = vpop.eup %2143 }
0x278f   :  { %v1504_v17 = vadd.f32 1.0, %v2144_v16 }
0x2791   :  { %2145 = vrcp.f32 %v1504_v17 }
0x279b   :  { %v2146_v18 = vpop.eup %2145 }
0x279c   :  { %v1517_v24 = vsub.f32 1.0, %v2146_v18  ;;  %v1526_v10 = vmul.f32 %v2146_v18, %v1524_v22 }
0x27f2   :  { %v1508_v19 = vpop.permute.xlu0 %1507 }
0x27f3   :  { %v1510_v20 = vmul.f32 %v2146_v18, %v1508_v19 }
0x27f5   :  { %1512 = vrot.lane.b32.xlu1 %v1510_v20, %s2232_s22 }
0x2867   :  { %v1513_v39 = vpop.permute.xlu1 %1512 }
0x2868   :  { %v1515_v43 = vadd.f32 %v1513_v39, %v2502_v42 }
0x286a   :  { %2147 = vtanh.f32 %v1515_v43 }
0x2874   :  { %v2148_v59 = vpop.eup %2147 }
0x2875   :  { %1519 = vrot.lane.b32.xlu0 %v2148_v59, %s2241_s2 }
0x28e7   :  { %v1520_v48 = vpop.permute.xlu0 %1519 }
0x28e8   :  { %v1522_v25 = vmul.f32 %v1520_v48, %v1517_v24 }
0x28ea   :  { %v1527_v26 = vadd.f32 %v1526_v10, %v1522_v25 }
0x28ec   :  { %v1528_v27 = vpack.c.bf16 %v1527_v26, %v1527_v26  ;;  %v1603_v21 = vrot.slane %v1527_v26, 6 }
0x28ee   :  { %v1530_v28 = vrot.slane %v1528_v27, 2 }
0x28f0   :  { %1531 = vrot.lane.b32.xlu1 %v1530_v28, %s2241_s2 }
0x2962   :  { %v1532_v29 = vpop.permute.xlu1 %1531 }
0x2963   :  { %2015 = vmatmul.mubr.msk.bf16.vlgmr.msra.gmra.mrb[36].mxu0 %vm212_vm9, %v1532_v29 }
0x2964   :  { %2028 = vmatprep.mubr.msk.bf16.mxu0 %vm2239_vm0, %v2238_v0  ;;  %2027 = vmatpush3.bf16.msra.mxu0 %v2054_v57  ;;  %v1799_v0 = vld [vmem:[#allocation6 + $0x5] ss:$0 sm:$0xff] }
0x2a36   :  { %v1570_v30 = vpop.f32.mrb[36].mxu0 }
0x2a37   :  { %v1571_v49 = vadd.f32 %v2489_v31, %v1570_v30  ;;  %v2016_v32 = vpop.f32.mrb[37].mxu0 }
0x2a38   :  { %v1573_v33 = vpop.f32.mrb[38].mxu0 }
0x2a39   :  { %v1577_v34 = vrot.slane %v1571_v49, 2  ;;  %v2017_v35 = vpop.f32.mrb[39].mxu0 }
0x2a3b   :  { %1586 = vrot.lane.b32.xlu0 %v1577_v34, %s2232_s22  ;;  %v1579_v36 = vadd.f32 %v1577_v34, %v2502_v42 }
0x2a3d   :  { %v1798_v37 = vmul.f32 -1.442695, %v1579_v36 }
0x2a3f   :  { %2149 = vpow2.f32 %v1798_v37 }
0x2a49   :  { %v2150_v50 = vpop.eup %2149 }
0x2a4a   :  { %v1583_v38 = vadd.f32 1.0, %v2150_v50 }
0x2a4c   :  { %2151 = vrcp.f32 %v1583_v38 }
0x2a56   :  { %v2152_v40 = vpop.eup %2151 }
0x2a57   :  { %v1596_v52 = vsub.f32 1.0, %v2152_v40  ;;  %v1605_v53 = vmul.f32 %v2152_v40, %v1603_v21 }
0x2aad   :  { %v1587_v41 = vpop.permute.xlu0 %1586 }
0x2aae   :  { %v1589_v44 = vmul.f32 %v2152_v40, %v1587_v41 }
0x2ab0   :  { %1591 = vrot.lane.b32.xlu1 %v1589_v44, %s2232_s22 }
0x2b22   :  { %v1592_v45 = vpop.permute.xlu1 %1591 }
0x2b23   :  { %v1594_v31 = vadd.f32 %v1592_v45, %v2502_v42 }
0x2b25   :  { %2153 = vtanh.f32 %v1594_v31 }
0x2b2f   :  { %v2154_v51 = vpop.eup %2153 }
0x2b30   :  { %1598 = vrot.lane.b32.xlu0 %v2154_v51, %s2241_s2 }
0x2ba2   :  { %v1599_v7 = vpop.permute.xlu0 %1598 }
0x2ba3   :  { %v1601_v54 = vmul.f32 %v1599_v7, %v1596_v52 }
0x2ba5   :  { %v1606_v23 = vadd.f32 %v1605_v53, %v1601_v54 }
0x2ba7   :  { %v1611_v55 = vpack.c.bf16 %v1606_v23, %v1606_v23 }
0x2ba9   :  { %v1618_v56 = vrot.slane %v1611_v55, 3 }
0x2bab   :  { %1619 = vrot.lane.b32.xlu1 %v1618_v56, %s2241_s2 }
0x2c1d   :  { %v1620_v42 = vpop.permute.xlu1 %1619 }
0x2c1e   :  { %2023 = vmatmul.mubr.msk.bf16.vlgmr.msra.gmra.mrb[36].mxu1 %vm212_vm9, %v1620_v42 }
0x2cf1   :  { %v1670_v58 = vpop.f32.mrb[36].mxu1 }
0x2cf2   :  { %v1671_v60 = vadd.f32 %v1799_v0, %v1670_v58  ;;  %v2024_v61 = vpop.f32.mrb[37].mxu1 }
0x2cf3   :  { %v1673_v62 = vpop.f32.mrb[38].mxu1 }
0x2cf4   :  { %v1677_v63 = vmul.f32 0.70710677, %v1671_v60  ;;  %v2025_v1 = vpop.f32.mrb[39].mxu1  ;;  %v1676_v3 = vmul.f32 0.5, %v1671_v60 }
0x2cf6   :  { %2155 = verf.f32 %v1677_v63 }
0x2d00   :  { %v2156_v2 = vpop.eup %2155 }
0x2d01   :  { %v1679_v4 = vadd.f32 1.0, %v2156_v2 }
0x2d03   :  { %v1680_v5 = vmul.f32 %v1679_v4, %v1676_v3 }
0x2d05   :  { %v1683_v6 = vpack.c.bf16 %v1680_v5, %v1680_v5 }
0x2d07   :  { %2029 = vmatmul.mubr.msk.bf16.vlgmr.msra.gmra.mrb[40].mxu0 %vm143_vm8, %v1683_v6 }
0x2dda   :  { %v1732_v9 = vpop.f32.mrb[40].mxu0 }
0x2ddb   :  { %v1733_v11 = vadd.f32 %v1803_v8, %v1732_v9  ;;  %v2030_v13 = vpop.f32.mrb[41].mxu0 }
0x2ddc   :  { %v1735_v14 = vpop.f32.mrb[42].mxu0 }
0x2ddd   :  { %v1806_v12 = vmul.f32 -1.442695, %v1733_v11  ;;  %v2031_v15 = vpop.f32.mrb[43].mxu0 }
0x2ddf   :  { %2157 = vpow2.f32 %v1806_v12 }
0x2de9   :  { %v2158_v16 = vpop.eup %2157 }
0x2dea   :  { %v1741_v17 = vadd.f32 1.0, %v2158_v16 }
0x2dec   :  { %2159 = vrcp.f32 %v1741_v17 }
0x2df6   :  { %v2160_v18 = vpop.eup %2159 }
0x2df7   :  { %1745 = vst.msk [vmem:[%s2608_s3] sm:$0x3] %vm1744_vm10, %v2160_v18 }
0x2df8   :  { %1750 = vsyncpa [#allocation3], 1 }
0x2df9   :  { %1751 = vsyncpa [#allocation5], 1 }

</bundles_post_ra>
